<compile_context>
chip_gen: v5e
topology: v5e:2x2
jax: 0.10.0
libtpu: 0.0.40
codegen_flags: <defaults>
</compile_context>

<pallas_src>
import functools

import jax
import jax.numpy as jnp
from jax.experimental import pallas as pl
from jax.experimental.pallas import tpu as pltpu


# --------------------------------------------------------------------------
# Fused Block kernel
# --------------------------------------------------------------------------

def _block_kernel(x_ref, dw_ref, b1_ref, pw_ref, b2_ref, o_ref, *, stride):
    """Fused: depthwise 3x3 (stride, pad=1, BN1 scale pre-folded) + bias + ReLU6,
    then pointwise 1x1 (BN2 scale pre-folded, bf16 MXU) + bias + ReLU6."""
    _, Ho, Wo, Cout = o_ref.shape
    w = dw_ref[...]                       # [9, Cin], f32, BN1 scale already folded in
    Cin = w.shape[1]

    acc = jnp.zeros((1, Ho, Wo, Cin), jnp.float32)
    for di in range(3):
        for dj in range(3):
            if stride == 1:
                # Offset vector loads straight from the ref (no materialized-value slicing).
                tap = x_ref[:, di:di + Ho, dj:dj + Wo, :]
            else:
                # Space-to-depth input: x_ref[p*2+q, b, h2, w2, c] == x_pad[b, 2*h2+p, 2*w2+q, c]
                # so a stride-2 tap is again a static offset load.
                tap = x_ref[(di % 2) * 2 + (dj % 2), :,
                            di // 2:di // 2 + Ho, dj // 2:dj // 2 + Wo, :]
            acc = acc + tap * w[di * 3 + dj, :]

    h = jnp.clip(acc + b1_ref[0, :], 0.0, 6.0)                    # BN1 bias + ReLU6 (f32 VPU)

    # Pointwise 1x1 conv == matmul on the MXU; operands in bf16, accumulate in f32.
    h2 = h.reshape(Ho * Wo, Cin).astype(jnp.bfloat16)
    y = jnp.dot(h2, pw_ref[...], preferred_element_type=jnp.float32)
    y = jnp.clip(y + b2_ref[0, :], 0.0, 6.0)                      # BN2 bias + ReLU6
    o_ref[...] = y.reshape(1, Ho, Wo, Cout)


def block_forward(x_nchw, params, stride):
    """PyTorch Block.forward equivalent. x_nchw: [B, Cin, H, W] -> [B, Cout, Ho, Wo]."""
    x = jnp.transpose(x_nchw, (0, 2, 3, 1)).astype(jnp.float32)   # NCHW -> NHWC
    B, H, W, Cin = x.shape
    Cout = params["pw_w"].shape[1]
    Ho = (H - 1) // stride + 1
    Wo = (W - 1) // stride + 1

    x_pad = jnp.pad(x, ((0, 0), (1, 1), (1, 1), (0, 0)))
    if stride == 1:
        x_in = x_pad
        x_spec = pl.BlockSpec((1, H + 2, W + 2, Cin), lambda b: (b, 0, 0, 0))
    else:
        # Space-to-depth repack (one cheap JAX pass over the *input*, the smallest tensor in
        # the block) so the kernel's stride-2 taps are plain offset loads.
        Hp, Wp = H + 2, W + 2
        Hp2, Wp2 = Hp + (Hp % 2), Wp + (Wp % 2)
        x_pad = jnp.pad(x_pad, ((0, 0), (0, Hp2 - Hp), (0, Wp2 - Wp), (0, 0)))
        Hh, Wh = Hp2 // 2, Wp2 // 2
        x_in = (x_pad.reshape(B, Hh, 2, Wh, 2, Cin)
                     .transpose(2, 4, 0, 1, 3, 5)                 # [2,2,B,Hh,Wh,C]
                     .reshape(4, B, Hh, Wh, Cin))
        x_spec = pl.BlockSpec((4, 1, Hh, Wh, Cin), lambda b: (0, b, 0, 0, 0))

    kernel = functools.partial(_block_kernel, stride=stride)
    out_nhwc = pl.pallas_call(
        kernel,
        out_shape=jax.ShapeDtypeStruct((B, Ho, Wo, Cout), jnp.float32),
        grid=(B,),                                                # per-batch step; parallel on v7x
        in_specs=[
            x_spec,
            pl.BlockSpec((9, Cin), lambda b: (0, 0)),
            pl.BlockSpec((1, Cin), lambda b: (0, 0)),
            pl.BlockSpec((Cin, Cout), lambda b: (0, 0)),
            pl.BlockSpec((1, Cout), lambda b: (0, 0)),
        ],
        out_specs=pl.BlockSpec((1, Ho, Wo, Cout), lambda b: (b, 0, 0, 0)),
        compiler_params=pltpu.CompilerParams(dimension_semantics=("parallel",)),
    )(x_in, params["dw_w"], params["b1"], params["pw_w"], params["b2"])

    return jnp.transpose(out_nhwc, (0, 3, 1, 2))                  # back to NCHW like PyTorch


# --------------------------------------------------------------------------
# Parameters: PyTorch-layout raw weights + eval-mode BN folding
# --------------------------------------------------------------------------
# TODO(synk): training-mode BatchNorm (batch statistics + running-stat updates) is not
# implemented; BN is folded in eval form (running mean/var), i.e. inference semantics.

def init_block_params(key, in_planes, out_planes):
    ks = jax.random.split(key, 4)
    conv1_w = jax.random.normal(ks[0], (in_planes, 1, 3, 3), jnp.float32) * 0.2   # depthwise
    conv2_w = jax.random.normal(ks[1], (out_planes, in_planes, 1, 1), jnp.float32) * 0.1

    def bn(k, c):
        k1, k2, k3, k4 = jax.random.split(k, 4)
        return dict(
            gamma=1.0 + 0.1 * jax.random.normal(k1, (c,), jnp.float32),
            beta=0.05 * jax.random.normal(k2, (c,), jnp.float32),
            mean=0.1 * jax.random.normal(k3, (c,), jnp.float32),
            var=1.0 + 0.1 * jax.nn.softplus(jax.random.normal(k4, (c,), jnp.float32)),
        )

    return dict(conv1_w=conv1_w, bn1=bn(ks[2], in_planes),
                conv2_w=conv2_w, bn2=bn(ks[3], out_planes))


def fold_block_params(raw, eps=1e-5):
    """Fold eval-mode BN into the conv weights; biases stay separate. pw weight -> bf16."""
    bn1, bn2 = raw["bn1"], raw["bn2"]
    s1 = bn1["gamma"] / jnp.sqrt(bn1["var"] + eps)
    b1 = bn1["beta"] - bn1["mean"] * s1
    s2 = bn2["gamma"] / jnp.sqrt(bn2["var"] + eps)
    b2 = bn2["beta"] - bn2["mean"] * s2

    dw9 = jnp.transpose(raw["conv1_w"][:, 0, :, :], (1, 2, 0)).reshape(9, -1)   # [9, Cin]
    pw = raw["conv2_w"][:, :, 0, 0].T                                           # [Cin, Cout]
    return dict(
        dw_w=(dw9 * s1[None, :]).astype(jnp.float32),       # depthwise stays f32 (VPU)
        b1=b1.reshape(1, -1).astype(jnp.float32),
        pw_w=(pw * s2[None, :]).astype(jnp.bfloat16),        # MXU operand in bf16
        b2=b2.reshape(1, -1).astype(jnp.float32),
    )


# --------------------------------------------------------------------------
# Pure-JAX reference (raw params, explicit BN, full f32) for correctness check
# --------------------------------------------------------------------------

def block_reference(x_nchw, raw, stride, eps=1e-5):
    x = jnp.transpose(x_nchw, (0, 2, 3, 1)).astype(jnp.float32)
    C = x.shape[-1]
    wd = jnp.transpose(raw["conv1_w"], (2, 3, 1, 0))          # [3,3,1,Cin] HWIO, groups=Cin
    h = jax.lax.conv_general_dilated(
        x, wd, (stride, stride), ((1, 1), (1, 1)),
        dimension_numbers=("NHWC", "HWIO", "NHWC"), feature_group_count=C)
    bn1 = raw["bn1"]
    h = (h - bn1["mean"]) / jnp.sqrt(bn1["var"] + eps) * bn1["gamma"] + bn1["beta"]
    h = jnp.clip(h, 0.0, 6.0)
    pw = raw["conv2_w"][:, :, 0, 0].T
    y = jnp.einsum("bhwc,cn->bhwn", h, pw)
    bn2 = raw["bn2"]
    y = (y - bn2["mean"]) / jnp.sqrt(bn2["var"] + eps) * bn2["gamma"] + bn2["beta"]
    y = jnp.clip(y, 0.0, 6.0)
    return jnp.transpose(y, (0, 3, 1, 2))


if __name__ == "__main__":
    key = jax.random.PRNGKey(0)
    kp, kx = jax.random.split(key)
    B, Cin, H, W, Cout = 2, 32, 16, 16, 64
    x = jax.random.normal(kx, (B, Cin, H, W), jnp.float32)    # NCHW like PyTorch

    ok = True
    for stride in (1, 2):
        raw = init_block_params(jax.random.fold_in(kp, stride), Cin, Cout)
        params = fold_block_params(raw)
        fwd = jax.jit(functools.partial(block_forward, stride=stride))
        out = fwd(x, params)
        jax.block_until_ready(out)
        ref = block_reference(x, raw, stride)
        assert out.shape == (B, Cout, H // stride, W // stride), out.shape
        # bf16 MXU operands introduce <~1e-2 abs error; any indexing/stride/BN bug would be O(1).
        ok = ok and bool(jnp.allclose(out, ref, atol=5e-2, rtol=5e-2))

    assert ok, "Pallas Block output does not match the pure-JAX reference"
    print("KERNEL_OK")
</pallas_src>

<mosaic_0001>
module attributes {stable_mosaic.version = 11 : i64} {
  func.func @_block_kernel(%arg0: i32, %arg1: memref<1x18x18x32xf32, #tpu.memory_space<vmem>>, %arg2: memref<9x32xf32, #tpu.memory_space<vmem>>, %arg3: memref<1x32xf32, #tpu.memory_space<vmem>>, %arg4: memref<32x64xbf16, #tpu.memory_space<vmem>>, %arg5: memref<1x64xf32, #tpu.memory_space<vmem>>, %arg6: memref<1x16x16x64xf32, #tpu.memory_space<vmem>>) attributes {dimension_semantics = [#tpu.dimension_semantics<parallel>], iteration_bounds = array<i64: 2>, scalar_prefetch = 0 : i64, scratch_operands = 0 : i64, tpu.core_type = #tpu.core_type<tc>, window_params = [{transform_indices = @transform_0, window_bounds = array<i64: 1, 18, 18, 32>}, {pipeline_mode = #tpu.pipeline_mode<synchronous>, transform_indices = @transform_1, window_bounds = array<i64: 9, 32>}, {pipeline_mode = #tpu.pipeline_mode<synchronous>, transform_indices = @transform_2, window_bounds = array<i64: 1, 32>}, {pipeline_mode = #tpu.pipeline_mode<synchronous>, transform_indices = @transform_3, window_bounds = array<i64: 32, 64>}, {pipeline_mode = #tpu.pipeline_mode<synchronous>, transform_indices = @transform_4, window_bounds = array<i64: 1, 64>}, {transform_indices = @transform_5, window_bounds = array<i64: 1, 16, 16, 64>}]} {
    %c0 = arith.constant 0 : index
    %c0_0 = arith.constant 0 : index
    %0 = vector.load %arg2[%c0, %c0_0] : memref<9x32xf32, #tpu.memory_space<vmem>>, vector<9x32xf32>
    %cst = arith.constant 0.000000e+00 : f32
    %1 = vector.broadcast %cst : f32 to vector<1x16x16x32xf32>
    %c0_1 = arith.constant 0 : index
    %c0_2 = arith.constant 0 : index
    %c0_3 = arith.constant 0 : index
    %c0_4 = arith.constant 0 : index
    %2 = vector.load %arg1[%c0_1, %c0_2, %c0_3, %c0_4] : memref<1x18x18x32xf32, #tpu.memory_space<vmem>>, vector<1x16x16x32xf32>
    %3 = vector.extract_strided_slice %0 {offsets = [0, 0], sizes = [1, 32], strides = [1, 1]} : vector<9x32xf32> to vector<1x32xf32>
    %4 = vector.shape_cast %3 : vector<1x32xf32> to vector<32xf32>
    %5 = vector.shape_cast %4 : vector<32xf32> to vector<1x1x1x32xf32>
    %6 = vector.broadcast %5 : vector<1x1x1x32xf32> to vector<1x16x16x32xf32>
    %7 = arith.mulf %2, %6 : vector<1x16x16x32xf32>
    %8 = arith.addf %1, %7 : vector<1x16x16x32xf32>
    %c0_5 = arith.constant 0 : index
    %c0_6 = arith.constant 0 : index
    %c1 = arith.constant 1 : index
    %c0_7 = arith.constant 0 : index
    %9 = vector.load %arg1[%c0_5, %c0_6, %c1, %c0_7] : memref<1x18x18x32xf32, #tpu.memory_space<vmem>>, vector<1x16x16x32xf32>
    %10 = vector.extract_strided_slice %0 {offsets = [1, 0], sizes = [1, 32], strides = [1, 1]} : vector<9x32xf32> to vector<1x32xf32>
    %11 = vector.shape_cast %10 : vector<1x32xf32> to vector<32xf32>
    %12 = vector.shape_cast %11 : vector<32xf32> to vector<1x1x1x32xf32>
    %13 = vector.broadcast %12 : vector<1x1x1x32xf32> to vector<1x16x16x32xf32>
    %14 = arith.mulf %9, %13 : vector<1x16x16x32xf32>
    %15 = arith.addf %8, %14 : vector<1x16x16x32xf32>
    %c0_8 = arith.constant 0 : index
    %c0_9 = arith.constant 0 : index
    %c2 = arith.constant 2 : index
    %c0_10 = arith.constant 0 : index
    %16 = vector.load %arg1[%c0_8, %c0_9, %c2, %c0_10] : memref<1x18x18x32xf32, #tpu.memory_space<vmem>>, vector<1x16x16x32xf32>
    %17 = vector.extract_strided_slice %0 {offsets = [2, 0], sizes = [1, 32], strides = [1, 1]} : vector<9x32xf32> to vector<1x32xf32>
    %18 = vector.shape_cast %17 : vector<1x32xf32> to vector<32xf32>
    %19 = vector.shape_cast %18 : vector<32xf32> to vector<1x1x1x32xf32>
    %20 = vector.broadcast %19 : vector<1x1x1x32xf32> to vector<1x16x16x32xf32>
    %21 = arith.mulf %16, %20 : vector<1x16x16x32xf32>
    %22 = arith.addf %15, %21 : vector<1x16x16x32xf32>
    %c0_11 = arith.constant 0 : index
    %c1_12 = arith.constant 1 : index
    %c0_13 = arith.constant 0 : index
    %c0_14 = arith.constant 0 : index
    %23 = vector.load %arg1[%c0_11, %c1_12, %c0_13, %c0_14] : memref<1x18x18x32xf32, #tpu.memory_space<vmem>>, vector<1x16x16x32xf32>
    %24 = vector.extract_strided_slice %0 {offsets = [3, 0], sizes = [1, 32], strides = [1, 1]} : vector<9x32xf32> to vector<1x32xf32>
    %25 = vector.shape_cast %24 : vector<1x32xf32> to vector<32xf32>
    %26 = vector.shape_cast %25 : vector<32xf32> to vector<1x1x1x32xf32>
    %27 = vector.broadcast %26 : vector<1x1x1x32xf32> to vector<1x16x16x32xf32>
    %28 = arith.mulf %23, %27 : vector<1x16x16x32xf32>
    %29 = arith.addf %22, %28 : vector<1x16x16x32xf32>
    %c0_15 = arith.constant 0 : index
    %c1_16 = arith.constant 1 : index
    %c1_17 = arith.constant 1 : index
    %c0_18 = arith.constant 0 : index
    %30 = vector.load %arg1[%c0_15, %c1_16, %c1_17, %c0_18] : memref<1x18x18x32xf32, #tpu.memory_space<vmem>>, vector<1x16x16x32xf32>
    %31 = vector.extract_strided_slice %0 {offsets = [4, 0], sizes = [1, 32], strides = [1, 1]} : vector<9x32xf32> to vector<1x32xf32>
    %32 = vector.shape_cast %31 : vector<1x32xf32> to vector<32xf32>
    %33 = vector.shape_cast %32 : vector<32xf32> to vector<1x1x1x32xf32>
    %34 = vector.broadcast %33 : vector<1x1x1x32xf32> to vector<1x16x16x32xf32>
    %35 = arith.mulf %30, %34 : vector<1x16x16x32xf32>
    %36 = arith.addf %29, %35 : vector<1x16x16x32xf32>
    %c0_19 = arith.constant 0 : index
    %c1_20 = arith.constant 1 : index
    %c2_21 = arith.constant 2 : index
    %c0_22 = arith.constant 0 : index
    %37 = vector.load %arg1[%c0_19, %c1_20, %c2_21, %c0_22] : memref<1x18x18x32xf32, #tpu.memory_space<vmem>>, vector<1x16x16x32xf32>
    %38 = vector.extract_strided_slice %0 {offsets = [5, 0], sizes = [1, 32], strides = [1, 1]} : vector<9x32xf32> to vector<1x32xf32>
    %39 = vector.shape_cast %38 : vector<1x32xf32> to vector<32xf32>
    %40 = vector.shape_cast %39 : vector<32xf32> to vector<1x1x1x32xf32>
    %41 = vector.broadcast %40 : vector<1x1x1x32xf32> to vector<1x16x16x32xf32>
    %42 = arith.mulf %37, %41 : vector<1x16x16x32xf32>
    %43 = arith.addf %36, %42 : vector<1x16x16x32xf32>
    %c0_23 = arith.constant 0 : index
    %c2_24 = arith.constant 2 : index
    %c0_25 = arith.constant 0 : index
    %c0_26 = arith.constant 0 : index
    %44 = vector.load %arg1[%c0_23, %c2_24, %c0_25, %c0_26] : memref<1x18x18x32xf32, #tpu.memory_space<vmem>>, vector<1x16x16x32xf32>
    %45 = vector.extract_strided_slice %0 {offsets = [6, 0], sizes = [1, 32], strides = [1, 1]} : vector<9x32xf32> to vector<1x32xf32>
    %46 = vector.shape_cast %45 : vector<1x32xf32> to vector<32xf32>
    %47 = vector.shape_cast %46 : vector<32xf32> to vector<1x1x1x32xf32>
    %48 = vector.broadcast %47 : vector<1x1x1x32xf32> to vector<1x16x16x32xf32>
    %49 = arith.mulf %44, %48 : vector<1x16x16x32xf32>
    %50 = arith.addf %43, %49 : vector<1x16x16x32xf32>
    %c0_27 = arith.constant 0 : index
    %c2_28 = arith.constant 2 : index
    %c1_29 = arith.constant 1 : index
    %c0_30 = arith.constant 0 : index
    %51 = vector.load %arg1[%c0_27, %c2_28, %c1_29, %c0_30] : memref<1x18x18x32xf32, #tpu.memory_space<vmem>>, vector<1x16x16x32xf32>
    %52 = vector.extract_strided_slice %0 {offsets = [7, 0], sizes = [1, 32], strides = [1, 1]} : vector<9x32xf32> to vector<1x32xf32>
    %53 = vector.shape_cast %52 : vector<1x32xf32> to vector<32xf32>
    %54 = vector.shape_cast %53 : vector<32xf32> to vector<1x1x1x32xf32>
    %55 = vector.broadcast %54 : vector<1x1x1x32xf32> to vector<1x16x16x32xf32>
    %56 = arith.mulf %51, %55 : vector<1x16x16x32xf32>
    %57 = arith.addf %50, %56 : vector<1x16x16x32xf32>
    %c0_31 = arith.constant 0 : index
    %c2_32 = arith.constant 2 : index
    %c2_33 = arith.constant 2 : index
    %c0_34 = arith.constant 0 : index
    %58 = vector.load %arg1[%c0_31, %c2_32, %c2_33, %c0_34] : memref<1x18x18x32xf32, #tpu.memory_space<vmem>>, vector<1x16x16x32xf32>
    %59 = vector.extract_strided_slice %0 {offsets = [8, 0], sizes = [1, 32], strides = [1, 1]} : vector<9x32xf32> to vector<1x32xf32>
    %60 = vector.shape_cast %59 : vector<1x32xf32> to vector<32xf32>
    %61 = vector.shape_cast %60 : vector<32xf32> to vector<1x1x1x32xf32>
    %62 = vector.broadcast %61 : vector<1x1x1x32xf32> to vector<1x16x16x32xf32>
    %63 = arith.mulf %58, %62 : vector<1x16x16x32xf32>
    %64 = arith.addf %57, %63 : vector<1x16x16x32xf32>
    %c0_35 = arith.constant 0 : index
    %c0_36 = arith.constant 0 : index
    %65 = vector.load %arg3[%c0_35, %c0_36] : memref<1x32xf32, #tpu.memory_space<vmem>>, vector<1x32xf32>
    %66 = vector.shape_cast %65 : vector<1x32xf32> to vector<32xf32>
    %67 = vector.shape_cast %66 : vector<32xf32> to vector<1x1x1x32xf32>
    %68 = vector.broadcast %67 : vector<1x1x1x32xf32> to vector<1x16x16x32xf32>
    %69 = arith.addf %64, %68 : vector<1x16x16x32xf32>
    %cst_37 = arith.constant 0.000000e+00 : f32
    %cst_38 = arith.constant 6.000000e+00 : f32
    %70 = vector.broadcast %cst_37 : f32 to vector<1x16x16x32xf32>
    %71 = arith.maximumf %70, %69 : vector<1x16x16x32xf32>
    %72 = vector.broadcast %cst_38 : f32 to vector<1x16x16x32xf32>
    %73 = arith.minimumf %72, %71 : vector<1x16x16x32xf32>
    %74 = vector.shape_cast %73 : vector<1x16x16x32xf32> to vector<256x32xf32>
    %75 = arith.truncf %74 : vector<256x32xf32> to vector<256x32xbf16>
    %c0_39 = arith.constant 0 : index
    %c0_40 = arith.constant 0 : index
    %76 = vector.load %arg4[%c0_39, %c0_40] : memref<32x64xbf16, #tpu.memory_space<vmem>>, vector<32x64xbf16>
    %cst_41 = arith.constant dense<0.000000e+00> : vector<256x64xf32>
    %77 = tpu.matmul %75, %76, %cst_41 {dimension_numbers = #tpu.dot_dimension_numbers<[1], [0], [0], [1], [0, 0, 1, 1], [], []>} : vector<256x32xbf16>, vector<32x64xbf16>, vector<256x64xf32> -> vector<256x64xf32>
    %c0_42 = arith.constant 0 : index
    %c0_43 = arith.constant 0 : index
    %78 = vector.load %arg5[%c0_42, %c0_43] : memref<1x64xf32, #tpu.memory_space<vmem>>, vector<1x64xf32>
    %79 = vector.shape_cast %78 : vector<1x64xf32> to vector<64xf32>
    %80 = vector.shape_cast %79 : vector<64xf32> to vector<1x64xf32>
    %81 = vector.broadcast %80 : vector<1x64xf32> to vector<256x64xf32>
    %82 = arith.addf %77, %81 : vector<256x64xf32>
    %cst_44 = arith.constant 0.000000e+00 : f32
    %cst_45 = arith.constant 6.000000e+00 : f32
    %83 = vector.broadcast %cst_44 : f32 to vector<256x64xf32>
    %84 = arith.maximumf %83, %82 : vector<256x64xf32>
    %85 = vector.broadcast %cst_45 : f32 to vector<256x64xf32>
    %86 = arith.minimumf %85, %84 : vector<256x64xf32>
    %87 = vector.shape_cast %86 : vector<256x64xf32> to vector<1x16x16x64xf32>
    %c0_46 = arith.constant 0 : index
    %c0_47 = arith.constant 0 : index
    %c0_48 = arith.constant 0 : index
    %c0_49 = arith.constant 0 : index
    %88 = vector.load %arg6[%c0_46, %c0_47, %c0_48, %c0_49] : memref<1x16x16x64xf32, #tpu.memory_space<vmem>>, vector<1x16x16x64xf32>
    tpu.vector_store %arg6[%c0_46, %c0_47, %c0_48, %c0_49], %87 {strides = array<i32>} : memref<1x16x16x64xf32, #tpu.memory_space<vmem>>, vector<1x16x16x64xf32>,
    return
  }
  func.func @transform_0(%arg0: i32) -> (i32, i32, i32, i32) {
    %c0_i32 = arith.constant 0 : i32
    %c0_i32_0 = arith.constant 0 : i32
    %c0_i32_1 = arith.constant 0 : i32
    %c0_i32_2 = arith.constant 0 : i32
    return %arg0, %c0_i32, %c0_i32_0, %c0_i32_1 : i32, i32, i32, i32
  }
  func.func @transform_1(%arg0: i32) -> (i32, i32) {
    %c0_i32 = arith.constant 0 : i32
    %c0_i32_0 = arith.constant 0 : i32
    %c0_i32_1 = arith.constant 0 : i32
    return %c0_i32, %c0_i32_0 : i32, i32
  }
  func.func @transform_2(%arg0: i32) -> (i32, i32) {
    %c0_i32 = arith.constant 0 : i32
    %c0_i32_0 = arith.constant 0 : i32
    %c0_i32_1 = arith.constant 0 : i32
    return %c0_i32, %c0_i32_0 : i32, i32
  }
  func.func @transform_3(%arg0: i32) -> (i32, i32) {
    %c0_i32 = arith.constant 0 : i32
    %c0_i32_0 = arith.constant 0 : i32
    %c0_i32_1 = arith.constant 0 : i32
    return %c0_i32, %c0_i32_0 : i32, i32
  }
  func.func @transform_4(%arg0: i32) -> (i32, i32) {
    %c0_i32 = arith.constant 0 : i32
    %c0_i32_0 = arith.constant 0 : i32
    %c0_i32_1 = arith.constant 0 : i32
    return %c0_i32, %c0_i32_0 : i32, i32
  }
  func.func @transform_5(%arg0: i32) -> (i32, i32, i32, i32) {
    %c0_i32 = arith.constant 0 : i32
    %c0_i32_0 = arith.constant 0 : i32
    %c0_i32_1 = arith.constant 0 : i32
    %c0_i32_2 = arith.constant 0 : i32
    return %arg0, %c0_i32, %c0_i32_0, %c0_i32_1 : i32, i32, i32, i32
  }
}

</mosaic_0001>

<bundles_post_ra>
// kernel: block_forward.1
= control target key start
LH: loop header
LB: loop body
LE: loop exit
PB: predicated region body
PF: predicated region fallthrough
CT: control target
= control target key end

     0   :  { %10 = vsyncpa [#allocation3], 0  ;;  %s3093_s0 = inlined_call_operand.vmem [shape: f32[2,18,18,32], index: 0, kind: input, shape index: {}]   ;;  %s3094_s1 = inlined_call_operand.vmem [shape: f32[9,32], index: 1, kind: input, shape index: {}]   ;;  %s3095_s2 = inlined_call_operand.vmem [shape: f32[1,32], index: 2, kind: input, shape index: {}]   ;;  %s3096_s3 = inlined_call_operand.vmem [shape: bf16[32,64], index: 3, kind: input, shape index: {}]   ;;  %s3097_s4 = inlined_call_operand.vmem [shape: f32[1,64], index: 4, kind: input, shape index: {}]   ;;  %s3098_s5 = inlined_call_operand.hbm [shape: f32[2,16,16,64], index: 5, kind: output, shape index: {}]  }
   0x1   :  { %12 = vsyncpa [#allocation3 + $0x1], 0  ;;  %s1929_s18 = smov 0   ;;  %s1931_s19 = smov 0  }
   0x2   :  { %s1933_s20 = smov 0   ;;  %s1935_s21 = smov 0  }
   0x3 LB: > { %s1950_s22 = sadd.s32 4294967295, %s1895_s21   ;;  %s1550_s23 = sadd.s32 4294967294, %s1895_s21   ;;  %s1895_s21 = sphi %s1935_s21, %s3290_s21   ;;  %s1891_s20 = sphi %s1933_s20, %s3289_s20   ;;  %s1887_s19 = sphi %s1931_s19, %s3288_s19   ;;  %s1883_s18 = sphi %s1929_s18, %s3287_s18  }
   0x4   : > { %s1954_s24 = sadd.s32 1, %s1895_s21   ;;  %s135_s25 = sadd.s32 1, %s1891_s20 }
   0x5   : > { %s132_s26 = ssub.s32 %s1895_s21, %s1954_s24  ;;  %p145_p0 = scmp.ne.s32.totalorder %s1891_s20, %s1887_s19 }
   0x6   : > { %p133_p1 = scmp.eq.s32.totalorder %s132_s26, 0  ;;  %p146_p2 = scmp.eq.s32.totalorder %s1950_s22, 1 }
   0x7   : > { %p151_p3 = scmp.ne.s32.totalorder %s1887_s19, %s1883_s18  ;;  %p152_p4 = scmp.eq.s32.totalorder %s1550_s23, 1 }
   0x8   : > { %s1965_s27 = scalar_select %p133_p1, %s1891_s20, %s135_s25  }
   0x9   : > { %p1967_p5 = por %p146_p2, %p145_p0  ;;  %p1971_p6 = por %p152_p4, %p151_p3 }
   0xa   : > { %p1553_p7 = scmp.ge.s32.totalorder %s1895_s21, 1  ;;  %p190_p8 = scmp.lt.s32.totalorder %s1895_s21, 3 }
   0xc   : > { %p191_p9 = pnand %p1553_p7, %p190_p8 }
   0xe   : > { %194 = sbr.rel (%p191_p9) target bundleno = 355 (0x163), region = 40 }
  0x13   : > { %v1778_v0 = vld [vmem:[%s3096_s3 + $0x8] sm:$0xff]  ;;  %p218_p10 = scmp.lt.s32.totalorder %s1950_s22, 1  ;;  %v224_v1 = vld [vmem:[%s3094_s1] sm:$0xff]  ;;  %vm1237_vm0 = vcmask 261120   ;;  %s215_s10 = sand.u32 1, %s1887_s19   ;;  %vm1439_vm1 = vcmask 523264  }
  0x14   : > { %1292 = vmatpush.bf16.msra.mxu0 %v1778_v0  ;;  %1780 = vmatpush.bf16.msra.mxu1 %v1778_v0  ;;  %v1777_v2 = vld [vmem:[%s3096_s3] sm:$0xff]  ;;  %v1988_v3 = vperm.slane %v224_v1, 0  ;;  %v1990_v4 = vperm.slane %v224_v1, 1  ;;  %v1992_v5 = vperm.slane %v224_v1, 2  ;;  %v1999_v6 = vperm.slane %v224_v1, 3  ;;  %s1779_s13 = sshll.u32 %s1950_s22, 8 }
  0x15   : > { %s219_s11 = scalar_select %p218_p10, %s1950_s22, 1  ;;  %1781 = vmatpush.bf16.msra.mxu2 %v1778_v0  ;;  %1782 = vmatpush.bf16.msra.mxu3 %v1778_v0  ;;  %v2001_v7 = vperm.slane %v224_v1, 4  ;;  %v2006_v11 = vperm.slane %v224_v1, 5  ;;  %v2008_v12 = vperm.slane %v224_v1, 6  ;;  %v2013_v13 = vld [vmem:[%s3094_s1 + $0x8] ss:$0 sm:$0xff] }
  0x16   : > { %v2021_v20 = vperm.slane %v224_v1, 7  ;;  %s1484_s16 = scalar_lea.hbm %s3098_s5, %s1779_s13  ;;  %s1473_s22 = scalar_lea.sflag [#allocation3], %s215_s10 }
  0x17   : > { %s1786_s12 = smul.u32 432, %s219_s11  ;;  %s1554_s11 = sshll.u32 %s215_s10, 8 }
  0x18   : > { %1293 = vmatpush.bf16.msra.mxu0 %v1777_v2  ;;  %1783 = vmatpush.bf16.msra.mxu1 %v1777_v2  ;;  %s1487_s23 = sshll.u32 %s1484_s16, 4  ;;  %s1853_s7 = scalar_lea.hbm %s3098_s5, 512  ;;  %s1488_s23 = int_to_ptr.hbm [resolvable:$true] %s1487_s23 }
  0x19   : > { %s1997_s15 = scalar_lea.vmem %s3093_s0, %s1786_s12  ;;  %1784 = vmatpush.bf16.msra.mxu2 %v1777_v2  ;;  %1785 = vmatpush.bf16.msra.mxu3 %v1777_v2  ;;  %s2960_s12 = scalar_lea.vmem [#allocation2], %s1554_s11 }
  0x1a   : > { %v226_v8 = vld [vmem:[%s1997_s15] sm:$0xff]  ;;  %v227_v9 = vld [vmem:[%s1997_s15 + $0x8] sm:$0xff]  ;;  %v2027_v24 = vld [vmem:[%s1997_s15 + $0x18] sm:$0xff]  ;;  %s1485_s17 = sshll.u32 %s2960_s12, 4  ;;  %s1847_s25 = sshra.s32 %s1488_s23, 4  ;;  %s1486_s17 = int_to_ptr.vmem [resolvable:$true] %s1485_s17  ;;  %s1848_s25 = int_to_ptr.hbm [resolvable:$true] %s1847_s25 }
  0x1b   : > { %v323_v10 = vld [vmem:[%s1997_s15 + $0x1] sm:$0xff]  ;;  %v259_v14 = vmul.f32 %v1988_v3, %v226_v8  ;;  %v260_v15 = vmul.f32 %v1988_v3, %v227_v9  ;;  %v324_v16 = vld [vmem:[%s1997_s15 + $0x9] sm:$0xff]  ;;  %v2033_v26 = vld [vmem:[%s1997_s15 + $0x19] sm:$0xff]  ;;  %v551_v28 = vmul.f32 %v2027_v24, %v1999_v6  ;;  %s1849_s26 = scalar_lea.hbm %s1848_s25, 256  ;;  %p1854_p0 = scmp.lt.s32.totalorder %s1848_s25, %s3098_s5 }
  0x1c   : > { %v356_v17 = vmul.f32 %v1990_v4, %v323_v10  ;;  %v420_v18 = vld [vmem:[%s1997_s15 + $0x2] sm:$0xff]  ;;  %v421_v19 = vld [vmem:[%s1997_s15 + $0xa] sm:$0xff]  ;;  %v357_v21 = vmul.f32 %v1990_v4, %v324_v16  ;;  %v648_v31 = vmul.f32 %v2033_v26, %v2001_v7  ;;  %v2045_v32 = vld [vmem:[%s1997_s15 + $0x1a] sm:$0xff]  ;;  %p1850_p11 = scmp.ne.s32.totalorder %s1848_s25, %s1849_s26  ;;  %p1855_p1 = scmp.lt.s32.totalorder %s1853_s7, %s1849_s26 }
  0x1d   : > { %v453_v22 = vmul.f32 %v1992_v5, %v420_v18  ;;  %v454_v23 = vmul.f32 %v1992_v5, %v421_v19  ;;  %v2030_v25 = vld [vmem:[%s1997_s15 + $0x20] sm:$0xff]  ;;  %v745_v36 = vmul.f32 %v2045_v32, %v2006_v11  ;;  %v2057_v38 = vld [vmem:[%s1997_s15 + $0x30] sm:$0xff]  ;;  %v2060_v39 = vld [vmem:[%s1997_s15 + $0x38] sm:$0xff] }
  0x1e   : > { %v388_v27 = vadd.f32 %v356_v17, %v259_v14  ;;  %v552_v29 = vmul.f32 %v2030_v25, %v1999_v6  ;;  %v2040_v30 = vld [vmem:[%s1997_s15 + $0x21] sm:$0xff]  ;;  %v389_v34 = vadd.f32 %v357_v21, %v260_v15  ;;  %v2063_v40 = vld [vmem:[%s1997_s15 + $0x31] sm:$0xff]  ;;  %v843_v42 = vmul.f32 %v2057_v38, %v2008_v12  ;;  %v2070_v44 = vld [vmem:[%s1997_s15 + $0x39] sm:$0xff]  ;;  %p1851_p12 = pnand %p1850_p11, %p1967_p5  ;;  %p1856_p2 = por %p1855_p1, %p1854_p0 }
  0x1f   : > { %v2048_v33 = vld [vmem:[%s1997_s15 + $0x22] sm:$0xff]  ;;  %v649_v35 = vmul.f32 %v2040_v30, %v2001_v7  ;;  %v844_v43 = vmul.f32 %v2060_v39, %v2008_v12  ;;  %v2074_v45 = vmul.f32 %v2063_v40, %v2021_v20  ;;  %v2077_v46 = vld [vmem:[%s1997_s15 + $0x32] sm:$0xff]  ;;  %v2080_v47 = vld [vmem:[%s1997_s15 + $0x3a] sm:$0xff]  ;;  %v2084_v49 = vmul.f32 %v2070_v44, %v2021_v20 }
  0x20   : > { %v746_v37 = vmul.f32 %v2048_v33, %v2006_v11  ;;  %v485_v41 = vadd.f32 %v453_v22, %v388_v27  ;;  %v486_v48 = vadd.f32 %v454_v23, %v389_v34  ;;  %v2088_v50 = vmul.f32 %v2013_v13, %v2077_v46  ;;  %v2095_v52 = vld [vmem:[%s1997_s15 + $0x60] sm:$0xff]  ;;  %v2098_v53 = vld [vmem:[%s1997_s15 + $0x68] sm:$0xff]  ;;  %v2125_v2 = vld [vmem:[%s1997_s15 + $0x78] sm:$0xff]  ;;  %p1852_p13 = pneg %p1851_p12 }
  0x21   : > { %v2092_v51 = vmul.f32 %v2013_v13, %v2080_v47  ;;  %3178 = vst [vmem:[#allocation5_spill] sm:$0xff] %v2095_v52  ;;  %v2101_v54 = vld [vmem:[%s1997_s15 + $0x61] sm:$0xff]  ;;  %v267_v56 = vmul.f32 %v1988_v3, %v2095_v52  ;;  %v268_v57 = vmul.f32 %v1988_v3, %v2098_v53  ;;  %v2108_v58 = vld [vmem:[%s1997_s15 + $0x69] sm:$0xff]  ;;  %v2131_v9 = vld [vmem:[%s1997_s15 + $0x79] sm:$0xff]  ;;  %v559_v15 = vmul.f32 %v2125_v2, %v1999_v6 }
  0x22   : > { %3179 = vst [vmem:[#allocation6_spill] sm:$0xff] %v2098_v53  ;;  %v583_v55 = vadd.f32 %v551_v28, %v485_v41  ;;  %v364_v59 = vmul.f32 %v1990_v4, %v2101_v54  ;;  %v2113_v60 = vld [vmem:[%s1997_s15 + $0x62] sm:$0xff]  ;;  %v2116_v61 = vld [vmem:[%s1997_s15 + $0x6a] sm:$0xff]  ;;  %v584_v62 = vadd.f32 %v552_v29, %v486_v48  ;;  %v365_v63 = vmul.f32 %v1990_v4, %v2108_v58  ;;  %v2141_v18 = vld [vmem:[%s1997_s15 + $0x7a] sm:$0xff]  ;;  %p1857_p3 = pnand %p1856_p2, %p1852_p13 }
  0x23   : > { %3180 = vst [vmem:[#allocation7_spill] sm:$0xff] %v2101_v54  ;;  %v461_v0 = vmul.f32 %v1992_v5, %v2113_v60  ;;  %v462_v1 = vmul.f32 %v1992_v5, %v2116_v61  ;;  %v2128_v8 = vld [vmem:[%s1997_s15 + $0x80] sm:$0xff]  ;;  %v656_v23 = vmul.f32 %v2131_v9, %v2001_v7  ;;  %v2151_v28 = vld [vmem:[%s1997_s15 + $0x90] sm:$0xff]  ;;  %v2154_v29 = vld [vmem:[%s1997_s15 + $0x98] sm:$0xff] }
  0x24   : > { %3181 = vst [vmem:[#allocation8_spill] sm:$0xff] %v2108_v58  ;;  %v680_v10 = vadd.f32 %v648_v31, %v583_v55  ;;  %v396_v14 = vadd.f32 %v364_v59, %v267_v56  ;;  %v560_v16 = vmul.f32 %v2128_v8, %v1999_v6  ;;  %v2138_v17 = vld [vmem:[%s1997_s15 + $0x81] sm:$0xff]  ;;  %v681_v21 = vadd.f32 %v649_v35, %v584_v62  ;;  %v2157_v31 = vld [vmem:[%s1997_s15 + $0x91] sm:$0xff]  ;;  %v2164_v55 = vld [vmem:[%s1997_s15 + $0x99] sm:$0xff] }
  0x25   : > { %3182 = vst [vmem:[#allocation9_spill] sm:$0xff] %v2113_v60  ;;  %v2144_v19 = vld [vmem:[%s1997_s15 + $0x82] sm:$0xff]  ;;  %v397_v22 = vadd.f32 %v365_v63, %v268_v57  ;;  %v657_v27 = vmul.f32 %v2138_v17, %v2001_v7  ;;  %v753_v35 = vmul.f32 %v2141_v18, %v2006_v11  ;;  %v2167_v56 = vld [vmem:[%s1997_s15 + $0x92] sm:$0xff]  ;;  %v2170_v57 = vld [vmem:[%s1997_s15 + $0x9a] sm:$0xff]  ;;  %v852_v63 = vmul.f32 %v2154_v29, %v2008_v12 }
  0x26   : > { %3183 = vst [vmem:[#allocation10_spill] sm:$0xff] %v2116_v61  ;;  %v777_v34 = vadd.f32 %v745_v36, %v680_v10  ;;  %v493_v41 = vadd.f32 %v461_v0, %v396_v14  ;;  %v754_v48 = vmul.f32 %v2144_v19, %v2006_v11  ;;  %v778_v59 = vadd.f32 %v746_v37, %v681_v21  ;;  %v2177_v0 = vld [vmem:[%s1997_s15 + $0xc0] sm:$0xff]  ;;  %v2180_v10 = vld [vmem:[%s1997_s15 + $0xc8] sm:$0xff] }
  0x27   : > { %3184 = vst [vmem:[#allocation11_spill] sm:$0xff] %v2167_v56  ;;  %v494_v62 = vadd.f32 %v462_v1, %v397_v22  ;;  %v851_v36 = vmul.f32 %v2151_v28, %v2008_v12  ;;  %v948_v60 = vmul.f32 %v2157_v31, %v2021_v20  ;;  %v949_v37 = vmul.f32 %v2164_v55, %v2021_v20  ;;  %v2187_v1 = vld [vmem:[%s1997_s15 + $0xc1] sm:$0xff]  ;;  %v2190_v21 = vld [vmem:[%s1997_s15 + $0xc9] sm:$0xff]  ;;  %v2206_v53 = vld [vmem:[%s3095_s2] ss:$0 sm:$0xff] }
  0x28   : > { %3185 = vst [vmem:[#allocation12_spill] sm:$0xff] %v2170_v57  ;;  %v875_v14 = vadd.f32 %v843_v42, %v777_v34  ;;  %v591_v61 = vadd.f32 %v559_v15, %v493_v41  ;;  %v876_v22 = vadd.f32 %v844_v43, %v778_v59  ;;  %v1045_v54 = vmul.f32 %v2013_v13, %v2167_v56  ;;  %v2197_v15 = vld [vmem:[%s1997_s15 + $0xc2] sm:$0xff]  ;;  %v2200_v34 = vld [vmem:[%s1997_s15 + $0xca] sm:$0xff] }
  0x29   : > { %3186 = vst [vmem:[#allocation13_spill] sm:$0xff] %v2177_v0  ;;  %v592_v58 = vadd.f32 %v560_v16, %v494_v62  ;;  %v1046_v42 = vmul.f32 %v2013_v13, %v2170_v57  ;;  %v275_v16 = vmul.f32 %v1988_v3, %v2177_v0  ;;  %v276_v59 = vmul.f32 %v1988_v3, %v2180_v10  ;;  %v2218_v57 = vld [vmem:[%s1997_s15 + $0xd8] sm:$0xff]  ;;  %v2233_v56 = vld [vmem:[%s1997_s15 + $0xe1] sm:$0xff] }
  0x2a   : > { %3187 = vst [vmem:[#allocation14_spill] sm:$0xff] %v2180_v10  ;;  %v972_v41 = vadd.f32 %v2074_v45, %v875_v14  ;;  %v688_v43 = vadd.f32 %v656_v23, %v591_v61  ;;  %v973_v62 = vadd.f32 %v2084_v49, %v876_v22  ;;  %v372_v45 = vmul.f32 %v1990_v4, %v2187_v1  ;;  %v2221_v61 = vld [vmem:[%s1997_s15 + $0xe0] sm:$0xff] }
  0x2b   : > { %3188 = vst [vmem:[#allocation15_spill] sm:$0xff] %v2187_v1  ;;  %v689_v52 = vadd.f32 %v657_v27, %v592_v58  ;;  %v373_v14 = vmul.f32 %v1990_v4, %v2190_v21  ;;  %v469_v10 = vmul.f32 %v1992_v5, %v2197_v15  ;;  %v470_v49 = vmul.f32 %v1992_v5, %v2200_v34  ;;  %v2230_v1 = vld [vmem:[%s1997_s15 + $0xd9] sm:$0xff] }
  0x2c   : > { %3189 = vst [vmem:[#allocation16_spill] sm:$0xff] %v2190_v21  ;;  %v1069_v23 = vadd.f32 %v2088_v50, %v972_v41  ;;  %v785_v0 = vadd.f32 %v753_v35, %v688_v43  ;;  %v1070_v58 = vadd.f32 %v2092_v51, %v973_v62  ;;  %v404_v22 = vadd.f32 %v372_v45, %v275_v16  ;;  %v2245_v62 = vld [vmem:[%s1997_s15 + $0xe2] sm:$0xff] }
  0x2d   : > { %3190 = vst [vmem:[#allocation17_spill] sm:$0xff] %v2197_v15  ;;  %v786_v27 = vadd.f32 %v754_v48, %v689_v52  ;;  %v405_v21 = vadd.f32 %v373_v14, %v276_v59  ;;  %v567_v41 = vmul.f32 %v2218_v57, %v1999_v6  ;;  %v568_v43 = vmul.f32 %v2221_v61, %v1999_v6  ;;  %v2242_v59 = vld [vmem:[%s1997_s15 + $0xda] sm:$0xff] }
  0x2e   : > { %3191 = vst [vmem:[#allocation18_spill] sm:$0xff] %v2200_v34  ;;  %v1105_v50 = vadd.f32 %v2206_v53, %v1069_v23  ;;  %v883_v35 = vadd.f32 %v851_v36, %v785_v0  ;;  %v1106_v51 = vadd.f32 %v2206_v53, %v1070_v58  ;;  %v501_v48 = vadd.f32 %v469_v10, %v404_v22  ;;  %v2291_v34 = vld [vmem:[%s1997_s15 + $0x129] sm:$0xff] }
  0x2f   : > { %v884_v52 = vadd.f32 %v852_v63, %v786_v27  ;;  %v502_v16 = vadd.f32 %v470_v49, %v405_v21  ;;  %v664_v0 = vmul.f32 %v2230_v1, %v2001_v7  ;;  %v665_v14 = vmul.f32 %v2233_v56, %v2001_v7  ;;  %v2252_v21 = vld [vmem:[%s1997_s15 + $0xf0] sm:$0xff]  ;;  %v2255_v49 = vld [vmem:[%s1997_s15 + $0xf8] sm:$0xff]  ;;  %3201 = vst [vmem:[#allocation28_spill] sm:$0xff] %v2291_v34 }
  0x30   : > { %v1137_v45 = vmax.f32 %v1105_v50, 0.0  ;;  %v980_v36 = vadd.f32 %v948_v60, %v883_v35  ;;  %v1138_v23 = vmax.f32 %v1106_v51, 0.0  ;;  %v599_v63 = vadd.f32 %v567_v41, %v501_v48  ;;  %3192 = vst [vmem:[#allocation19_spill] sm:$0xff] %v2252_v21  ;;  %v2258_v27 = vld [vmem:[%s1997_s15 + $0xf1] sm:$0xff] }
  0x31   : > { %v981_v58 = vadd.f32 %v949_v37, %v884_v52  ;;  %v600_v10 = vadd.f32 %v568_v43, %v502_v16  ;;  %3193 = vst [vmem:[#allocation20_spill] sm:$0xff] %v2255_v49  ;;  %v761_v50 = vmul.f32 %v2242_v59, %v2006_v11  ;;  %v762_v35 = vmul.f32 %v2245_v62, %v2006_v11  ;;  %v2265_v52 = vld [vmem:[%s1997_s15 + $0xf9] sm:$0xff] }
  0x32   : > { %3194 = vst [vmem:[#allocation21_spill] sm:$0xff] %v2258_v27  ;;  %v1169_v60 = vmin.f32 %v1137_v45, 6.0  ;;  %v1077_v22 = vadd.f32 %v1045_v54, %v980_v36  ;;  %v1170_v51 = vmin.f32 %v1138_v23, 6.0  ;;  %v696_v41 = vadd.f32 %v664_v0, %v599_v63  ;;  %v2268_v48 = vld [vmem:[%s1997_s15 + $0xf2] sm:$0xff]  ;;  %v2271_v16 = vld [vmem:[%s1997_s15 + $0xfa] sm:$0xff] }
  0x33   : > { %v1078_v37 = vadd.f32 %v1046_v42, %v981_v58  ;;  %v697_v43 = vadd.f32 %v665_v14, %v600_v10  ;;  %3195 = vst [vmem:[#allocation22_spill] sm:$0xff] %v2265_v52  ;;  %v859_v45 = vmul.f32 %v2252_v21, %v2008_v12  ;;  %v860_v36 = vmul.f32 %v2255_v49, %v2008_v12  ;;  %v2281_v0 = vld [vmem:[%s1997_s15 + $0x120] sm:$0xff]  ;;  %v2285_v10 = vld [vmem:[%s1997_s15 + $0x128] sm:$0xff] }
  0x34   : > { %3196 = vst [vmem:[#allocation23_spill] sm:$0xff] %v2268_v48  ;;  %v1113_v54 = vadd.f32 %v2206_v53, %v1077_v22  ;;  %v956_v42 = vmul.f32 %v2258_v27, %v2021_v20  ;;  %v1201_v14 = vpack.c.bf16 %v1170_v51, %v1169_v60  ;;  %v793_v58 = vadd.f32 %v761_v50, %v696_v41  ;;  %v2288_v22 = vld [vmem:[%s1997_s15 + $0x121] sm:$0xff] }
  0x35   : > { %3197 = vst [vmem:[#allocation24_spill] sm:$0xff] %v2271_v16  ;;  %v1114_v23 = vadd.f32 %v2206_v53, %v1078_v37  ;;  %v794_v63 = vadd.f32 %v762_v35, %v697_v43  ;;  %v957_v27 = vmul.f32 %v2265_v52, %v2021_v20  ;;  %v1053_v60 = vmul.f32 %v2013_v13, %v2268_v48  ;;  %v2300_v50 = vld [vmem:[%s1997_s15 + $0x122] sm:$0xff]  ;;  %v2309_v52 = vld [vmem:[%s1997_s15 + $0x138] sm:$0xff] }
  0x36   : > { %3198 = vst [vmem:[#allocation25_spill] sm:$0xff] %v2281_v0  ;;  %v1145_v15 = vmax.f32 %v1113_v54, 0.0  ;;  %v1054_v51 = vmul.f32 %v2013_v13, %v2271_v16  ;;  %1756 = vmatmul.msk.bf16.vlgmr.msra.gmra.mxu0 %vm1237_vm0, %v1201_v14  ;;  %v891_v37 = vadd.f32 %v859_v45, %v793_v58  ;;  %v283_v43 = vmul.f32 %v1988_v3, %v2281_v0  ;;  %v2306_v54 = vld [vmem:[%s1997_s15 + $0x12a] sm:$0xff]  ;;  %v2323_v0 = vld [vmem:[%s1997_s15 + $0x139] sm:$0xff]  ;;  %v2326_v49 = vld [vmem:[%s1997_s15 + $0x141] sm:$0xff] }
  0x37   : > { %3199 = vst [vmem:[#allocation26_spill] sm:$0xff] %v2285_v10  ;;  %v1146_v35 = vmax.f32 %v1114_v23, 0.0  ;;  %v892_v41 = vadd.f32 %v860_v36, %v794_v63  ;;  %v284_v16 = vmul.f32 %v1988_v3, %v2285_v10  ;;  %v380_v14 = vmul.f32 %v1990_v4, %v2288_v22  ;;  %v2318_v36 = vld [vmem:[%s1997_s15 + $0x140] sm:$0xff] }
  0x38   : > { %3200 = vst [vmem:[#allocation27_spill] sm:$0xff] %v2288_v22  ;;  %v1177_v48 = vmin.f32 %v1145_v15, 6.0  ;;  %v381_v45 = vmul.f32 %v1990_v4, %v2291_v34  ;;  %v988_v58 = vadd.f32 %v956_v42, %v891_v37  ;;  %v477_v15 = vmul.f32 %v1992_v5, %v2300_v50  ;;  %v2333_v42 = vld [vmem:[%s1997_s15 + $0x13a] sm:$0xff] }
  0x39   : > { %3202 = vst [vmem:[#allocation29_spill] sm:$0xff] %v2300_v50  ;;  %v1178_v23 = vmin.f32 %v1146_v35, 6.0  ;;  %v989_v63 = vadd.f32 %v957_v27, %v892_v41  ;;  %v412_v10 = vadd.f32 %v380_v14, %v283_v43  ;;  %v478_v34 = vmul.f32 %v1992_v5, %v2306_v54  ;;  %v2336_v27 = vld [vmem:[%s1997_s15 + $0x142] sm:$0xff]  ;;  %v2344_v14 = vld [vmem:[%s1997_s15 + $0x158] sm:$0xff] }
  0x3a   : > { %3203 = vst [vmem:[#allocation30_spill] sm:$0xff] %v2306_v54  ;;  %v413_v22 = vadd.f32 %v381_v45, %v284_v16  ;;  %v575_v35 = vmul.f32 %v2309_v52, %v1999_v6  ;;  %v1085_v41 = vadd.f32 %v1053_v60, %v988_v58  ;;  %v576_v43 = vmul.f32 %v2318_v36, %v1999_v6  ;;  %v2341_v16 = vld [vmem:[%s1997_s15 + $0x150] sm:$0xff]  ;;  %v2354_v60 = vld [vmem:[%s1997_s15 + $0x159] sm:$0xff] }
  0x3b   : > { %3204 = vst [vmem:[#allocation31_spill] sm:$0xff] %v2309_v52  ;;  %v1205_v37 = vpack.c.bf16 %v1178_v23, %v1177_v48  ;;  %v1086_v50 = vadd.f32 %v1054_v51, %v989_v63  ;;  %v509_v45 = vadd.f32 %v477_v15, %v412_v10  ;;  %v672_v52 = vmul.f32 %v2323_v0, %v2001_v7  ;;  %v2351_v48 = vld [vmem:[%s1997_s15 + $0x151] sm:$0xff]  ;;  %v2367_v58 = vld [vmem:[%s1997_s15 + $0x15a] sm:$0xff] }
  0x3c   : > { %3205 = vst [vmem:[#allocation32_spill] sm:$0xff] %v2318_v36  ;;  %v510_v54 = vadd.f32 %v478_v34, %v413_v22  ;;  %v673_v21 = vmul.f32 %v2326_v49, %v2001_v7  ;;  %v1121_v51 = vadd.f32 %v2206_v53, %v1085_v41  ;;  %v769_v10 = vmul.f32 %v2333_v42, %v2006_v11  ;;  %v2364_v22 = vld [vmem:[%s1997_s15 + $0x152] sm:$0xff] }
  0x3d   : > { %3206 = vst [vmem:[#allocation33_spill] sm:$0xff] %v2323_v0  ;;  %1760 = vmatmul.msk.bf16.vlgmr.msra.gmra.mxu1 %vm1237_vm0, %v1205_v37  ;;  %v1122_v23 = vadd.f32 %v2206_v53, %v1086_v50  ;;  %v770_v34 = vmul.f32 %v2336_v27, %v2006_v11  ;;  %v607_v63 = vadd.f32 %v575_v35, %v509_v45 }
  0x3e   : > { %3207 = vst [vmem:[#allocation34_spill] sm:$0xff] %v2326_v49  ;;  %v608_v15 = vadd.f32 %v576_v43, %v510_v54  ;;  %v867_v49 = vmul.f32 %v2341_v16, %v2008_v12  ;;  %v868_v37 = vmul.f32 %v2344_v14, %v2008_v12  ;;  %v1153_v41 = vmax.f32 %v1121_v51, 0.0 }
  0x3f   : > { %3208 = vst [vmem:[#allocation35_spill] sm:$0xff] %v2333_v42  ;;  %v1154_v50 = vmax.f32 %v1122_v23, 0.0  ;;  %v964_v42 = vmul.f32 %v2351_v48, %v2021_v20  ;;  %v704_v0 = vadd.f32 %v672_v52, %v607_v63  ;;  %v1061_v35 = vmul.f32 %v2013_v13, %v2364_v22 }
  0x40   : > { %3209 = vst [vmem:[#allocation36_spill] sm:$0xff] %v2336_v27  ;;  %v965_v27 = vmul.f32 %v2354_v60, %v2021_v20  ;;  %v705_v36 = vadd.f32 %v673_v21, %v608_v15  ;;  %v1062_v54 = vmul.f32 %v2013_v13, %v2367_v58  ;;  %v1185_v43 = vmin.f32 %v1153_v41, 6.0 }
  0x41   : > { %3210 = vst [vmem:[#allocation37_spill] sm:$0xff] %v2354_v60  ;;  %v1186_v45 = vmin.f32 %v1154_v50, 6.0  ;;  %v261_v51 = vmul.f32 %v2027_v24, %v1988_v3  ;;  %v262_v23 = vmul.f32 %v2030_v25, %v1988_v3  ;;  %v801_v60 = vadd.f32 %v769_v10, %v704_v0  ;;  %v2402_v10 = vld [vmem:[%s1997_s15 + $0x49] sm:$0xff] }
  0x42   : > { %3211 = vst [vmem:[#allocation38_spill] sm:$0xff] %v2364_v22  ;;  %v802_v52 = vadd.f32 %v770_v34, %v705_v36  ;;  %v358_v21 = vmul.f32 %v2033_v26, %v1990_v4  ;;  %v359_v63 = vmul.f32 %v2040_v30, %v1990_v4  ;;  %v455_v41 = vmul.f32 %v2045_v32, %v1992_v5  ;;  %v2396_v36 = vld [vmem:[%s1997_s15 + $0x48] sm:$0xff]  ;;  %v2399_v30 = vld [vmem:[%s1997_s15 + $0x50] sm:$0xff] }
  0x43   : > { %3212 = vst [vmem:[#allocation39_spill] sm:$0xff] %v2367_v58  ;;  %v1209_v15 = vpack.c.bf16 %v1186_v45, %v1185_v43  ;;  %v456_v50 = vmul.f32 %v2048_v33, %v1992_v5  ;;  %v553_v24 = vmul.f32 %v2057_v38, %v1999_v6  ;;  %v899_v58 = vadd.f32 %v867_v49, %v801_v60 }
  0x44   : > { %v900_v25 = vadd.f32 %v868_v37, %v802_v52  ;;  %v390_v0 = vadd.f32 %v358_v21, %v261_v51  ;;  %v391_v26 = vadd.f32 %v359_v63, %v262_v23  ;;  %3213 = vst [vmem:[#allocation40_spill] sm:$0xff] %v2396_v36  ;;  %v554_v32 = vmul.f32 %v2060_v39, %v1999_v6  ;;  %v2414_v51 = vld [vmem:[%s1997_s15 + $0x51] sm:$0xff] }
  0x45   : > { %3214 = vst [vmem:[#allocation41_spill] sm:$0xff] %v2399_v30  ;;  %1764 = vmatmul.msk.bf16.vlgmr.msra.gmra.mxu2 %vm1237_vm0, %v1209_v15  ;;  %v650_v33 = vmul.f32 %v2063_v40, %v2001_v7  ;;  %v651_v49 = vmul.f32 %v2070_v44, %v2001_v7  ;;  %v747_v60 = vmul.f32 %v2077_v46, %v2006_v11  ;;  %v2417_v23 = vld [vmem:[%s1997_s15 + $0x4a] sm:$0xff]  ;;  %v2420_v52 = vld [vmem:[%s1997_s15 + $0x52] sm:$0xff] }
  0x46   : > { %3215 = vst [vmem:[#allocation42_spill] sm:$0xff] %v2402_v10  ;;  %v996_v34 = vadd.f32 %v964_v42, %v899_v58  ;;  %v997_v37 = vadd.f32 %v965_v27, %v900_v25  ;;  %v487_v43 = vadd.f32 %v455_v41, %v390_v0  ;;  %v488_v45 = vadd.f32 %v456_v50, %v391_v26 }
  0x47   : > { %v748_v21 = vmul.f32 %v2080_v47, %v2006_v11  ;;  %v845_v63 = vmul.f32 %v2396_v36, %v2008_v12  ;;  %v846_v15 = vmul.f32 %v2399_v30, %v2008_v12  ;;  %v942_v42 = vmul.f32 %v2402_v10, %v2021_v20 }
  0x48   : > { %v1093_v27 = vadd.f32 %v1061_v35, %v996_v34  ;;  %v1094_v58 = vadd.f32 %v1062_v54, %v997_v37  ;;  %v585_v41 = vadd.f32 %v553_v24, %v487_v43  ;;  %v586_v50 = vadd.f32 %v554_v32, %v488_v45 }
  0x49   : > { %v943_v25 = vmul.f32 %v2414_v51, %v2021_v20  ;;  %v1039_v0 = vmul.f32 %v2013_v13, %v2417_v23  ;;  %v1040_v26 = vmul.f32 %v2013_v13, %v2420_v52  ;;  %v269_v36 = vmul.f32 %v2125_v2, %v1988_v3 }
  0x4a   : > { %v1129_v30 = vadd.f32 %v2206_v53, %v1093_v27  ;;  %v1130_v10 = vadd.f32 %v2206_v53, %v1094_v58  ;;  %v682_v35 = vadd.f32 %v650_v33, %v585_v41  ;;  %v683_v54 = vadd.f32 %v651_v49, %v586_v50 }
  0x4b   : > { %v270_v24 = vmul.f32 %v2128_v8, %v1988_v3  ;;  %v366_v32 = vmul.f32 %v2131_v9, %v1990_v4  ;;  %v367_v34 = vmul.f32 %v2138_v17, %v1990_v4  ;;  %v463_v37 = vmul.f32 %v2141_v18, %v1992_v5 }
  0x4c   : > { %v1161_v43 = vmax.f32 %v1129_v30, 0.0  ;;  %v1162_v2 = vmax.f32 %v1130_v10, 0.0  ;;  %v779_v45 = vadd.f32 %v747_v60, %v682_v35  ;;  %v780_v27 = vadd.f32 %v748_v21, %v683_v54  ;;  %v2460_v21 = vld [vmem:[%s1997_s15 + $0xb0] sm:$0xff] }
  0x4d   : > { %v398_v33 = vadd.f32 %v366_v32, %v269_v36  ;;  %v399_v49 = vadd.f32 %v367_v34, %v270_v24  ;;  %v464_v8 = vmul.f32 %v2144_v19, %v1992_v5  ;;  %v561_v9 = vmul.f32 %v2151_v28, %v1999_v6  ;;  %v2457_v19 = vld [vmem:[%s1997_s15 + $0xa8] sm:$0xff]  ;;  %v2468_v24 = vld [vmem:[%s1997_s15 + $0xb1] sm:$0xff] }
  0x4e   : > { %v1193_v17 = vmin.f32 %v1161_v43, 6.0  ;;  %v1194_v58 = vmin.f32 %v1162_v2, 6.0  ;;  %v877_v41 = vadd.f32 %v845_v63, %v779_v45  ;;  %v878_v18 = vadd.f32 %v846_v15, %v780_v27  ;;  %v2465_v15 = vld [vmem:[%s1997_s15 + $0xa9] sm:$0xff]  ;;  %v3217_v2 = vld [vmem:[#allocation12_spill] sm:$0xff] }
  0x4f   : > { %v495_v30 = vadd.f32 %v463_v37, %v398_v33  ;;  %v496_v10 = vadd.f32 %v464_v8, %v399_v49  ;;  %v562_v36 = vmul.f32 %v2154_v29, %v1999_v6  ;;  %v658_v60 = vmul.f32 %v2157_v31, %v2001_v7  ;;  %v3216_v37 = vld [vmem:[#allocation11_spill] sm:$0xff] }
  0x50   : > { %v1213_v50 = vpack.c.bf16 %v1194_v58, %v1193_v17  ;;  %v974_v35 = vadd.f32 %v942_v42, %v877_v41  ;;  %v975_v54 = vadd.f32 %v943_v25, %v878_v18  ;;  %v659_v63 = vmul.f32 %v2164_v55, %v2001_v7  ;;  %v2475_v27 = vld [vmem:[%s1997_s15 + $0xaa] sm:$0xff]  ;;  %v2478_v33 = vld [vmem:[%s1997_s15 + $0xb2] sm:$0xff] }
  0x51   : > { %v593_v32 = vadd.f32 %v561_v9, %v495_v30  ;;  %v594_v34 = vadd.f32 %v562_v36, %v496_v10  ;;  %v755_v43 = vmul.f32 %v3216_v37, %v2006_v11  ;;  %v756_v45 = vmul.f32 %v3217_v2, %v2006_v11 }
  0x52   : > { %1768 = vmatmul.msk.bf16.vlgmr.msra.gmra.mxu3 %vm1237_vm0, %v1213_v50  ;;  %v1071_v42 = vadd.f32 %v1039_v0, %v974_v35  ;;  %v1072_v25 = vadd.f32 %v1040_v26, %v975_v54  ;;  %v853_v49 = vmul.f32 %v2457_v19, %v2008_v12  ;;  %v854_v8 = vmul.f32 %v2460_v21, %v2008_v12 }
  0x53   : > { %v690_v9 = vadd.f32 %v658_v60, %v593_v32  ;;  %v691_v17 = vadd.f32 %v659_v63, %v594_v34  ;;  %v950_v58 = vmul.f32 %v2465_v15, %v2021_v20  ;;  %v951_v41 = vmul.f32 %v2468_v24, %v2021_v20 }
  0x54   : > { %v1107_v18 = vadd.f32 %v2206_v53, %v1071_v42  ;;  %v1108_v30 = vadd.f32 %v2206_v53, %v1072_v25  ;;  %v1047_v0 = vmul.f32 %v2013_v13, %v2475_v27  ;;  %v1048_v26 = vmul.f32 %v2013_v13, %v2478_v33 }
  0x55   : > { %v787_v10 = vadd.f32 %v755_v43, %v690_v9  ;;  %v788_v36 = vadd.f32 %v756_v45, %v691_v17  ;;  %v277_v60 = vmul.f32 %v2218_v57, %v1988_v3  ;;  %v278_v50 = vmul.f32 %v2221_v61, %v1988_v3 }
  0x56   : > { %v1139_v35 = vmax.f32 %v1107_v18, 0.0  ;;  %v1140_v54 = vmax.f32 %v1108_v30, 0.0  ;;  %v374_v63 = vmul.f32 %v2230_v1, %v1990_v4  ;;  %v375_v32 = vmul.f32 %v2233_v56, %v1990_v4  ;;  %v3218_v56 = vld [vmem:[#allocation19_spill] sm:$0xff]  ;;  %v2512_v30 = vld [vmem:[%s1997_s15 + $0x108] sm:$0xff] }
  0x57   : > { %v885_v34 = vadd.f32 %v853_v49, %v787_v10  ;;  %v886_v42 = vadd.f32 %v854_v8, %v788_v36  ;;  %v471_v43 = vmul.f32 %v2242_v59, %v1992_v5  ;;  %v472_v57 = vmul.f32 %v2245_v62, %v1992_v5  ;;  %v3219_v8 = vld [vmem:[#allocation20_spill] sm:$0xff]  ;;  %3220 = vst [vmem:[#allocation11_spill] sm:$0xff] %v2512_v30  ;;  %v3221_v36 = vld [vmem:[#allocation21_spill] sm:$0xff] }
  0x58   : > { %v1171_v61 = vmin.f32 %v1139_v35, 6.0  ;;  %v1172_v45 = vmin.f32 %v1140_v54, 6.0  ;;  %v406_v25 = vadd.f32 %v374_v63, %v277_v60  ;;  %v407_v9 = vadd.f32 %v375_v32, %v278_v50  ;;  %v2517_v50 = vld [vmem:[%s1997_s15 + $0x110] sm:$0xff]  ;;  %v3224_v54 = vld [vmem:[#allocation22_spill] sm:$0xff] }
  0x59   : > { %v982_v17 = vadd.f32 %v950_v58, %v885_v34  ;;  %v983_v1 = vadd.f32 %v951_v41, %v886_v42  ;;  %v569_v49 = vmul.f32 %v3218_v56, %v1999_v6  ;;  %v570_v18 = vmul.f32 %v3219_v8, %v1999_v6  ;;  %3222 = vst [vmem:[#allocation12_spill] sm:$0xff] %v2517_v50  ;;  %v2520_v58 = vld [vmem:[%s1997_s15 + $0x109] sm:$0xff]  ;;  %v2527_v42 = vld [vmem:[%s1997_s15 + $0x111] sm:$0xff] }
  0x5a   : > { %v1202_v59 = vpack.c.bf16 %v1172_v45, %v1171_v61  ;;  %v503_v10 = vadd.f32 %v471_v43, %v406_v25  ;;  %v504_v62 = vadd.f32 %v472_v57, %v407_v9  ;;  %v666_v60 = vmul.f32 %v3221_v36, %v2001_v7  ;;  %3223 = vst [vmem:[#allocation19_spill] sm:$0xff] %v2520_v58  ;;  %v3225_v32 = vld [vmem:[#allocation23_spill] sm:$0xff]  ;;  %v3228_v45 = vld [vmem:[#allocation24_spill] sm:$0xff] }
  0x5b   : > { %v1079_v41 = vadd.f32 %v1047_v0, %v982_v17  ;;  %v1080_v35 = vadd.f32 %v1048_v26, %v983_v1  ;;  %v667_v63 = vmul.f32 %v3224_v54, %v2001_v7  ;;  %v763_v34 = vmul.f32 %v3225_v32, %v2006_v11  ;;  %3226 = vst [vmem:[#allocation20_spill] sm:$0xff] %v2527_v42  ;;  %v2530_v43 = vld [vmem:[%s1997_s15 + $0x10a] sm:$0xff]  ;;  %v2538_v26 = vld [vmem:[%s1997_s15 + $0x112] sm:$0xff] }
  0x5c   : > { %3227 = vst [vmem:[#allocation43_spill] sm:$0xff] %v2530_v43  ;;  %1757 = vmatmul.msk.bf16.gmra.mxu0 %vm1237_vm0, %v1202_v59  ;;  %v601_v57 = vadd.f32 %v569_v49, %v503_v10  ;;  %v602_v61 = vadd.f32 %v570_v18, %v504_v62  ;;  %v764_v25 = vmul.f32 %v3228_v45, %v2006_v11 }
  0x5d   : > { %v861_v0 = vmul.f32 %v2512_v30, %v2008_v12  ;;  %3229 = vst [vmem:[#allocation44_spill] sm:$0xff] %v2538_v26  ;;  %v1115_v9 = vadd.f32 %v2206_v53, %v1079_v41  ;;  %v1116_v17 = vadd.f32 %v2206_v53, %v1080_v35  ;;  %v862_v1 = vmul.f32 %v2517_v50, %v2008_v12  ;;  %v3230_v35 = vld [vmem:[#allocation31_spill] sm:$0xff] }
  0x5e   : > { %v958_v59 = vmul.f32 %v2520_v58, %v2021_v20  ;;  %v698_v49 = vadd.f32 %v666_v60, %v601_v57  ;;  %v699_v18 = vadd.f32 %v667_v63, %v602_v61  ;;  %v959_v10 = vmul.f32 %v2527_v42, %v2021_v20  ;;  %v3231_v60 = vld [vmem:[#allocation32_spill] sm:$0xff]  ;;  %v3232_v57 = vld [vmem:[#allocation33_spill] sm:$0xff] }
  0x5f   : > { %v1055_v62 = vmul.f32 %v2013_v13, %v2530_v43  ;;  %v1147_v30 = vmax.f32 %v1115_v9, 0.0  ;;  %v1148_v45 = vmax.f32 %v1116_v17, 0.0  ;;  %v1056_v41 = vmul.f32 %v2013_v13, %v2538_v26  ;;  %v3233_v9 = vld [vmem:[#allocation34_spill] sm:$0xff]  ;;  %v3234_v26 = vld [vmem:[#allocation35_spill] sm:$0xff] }
  0x60   : > { %v285_v32 = vmul.f32 %v3230_v35, %v1988_v3  ;;  %v795_v50 = vadd.f32 %v763_v34, %v698_v49  ;;  %v796_v54 = vadd.f32 %v764_v25, %v699_v18  ;;  %v286_v63 = vmul.f32 %v3231_v60, %v1988_v3  ;;  %v3235_v18 = vld [vmem:[#allocation36_spill] sm:$0xff] }
  0x61   : > { %v382_v61 = vmul.f32 %v3232_v57, %v1990_v4  ;;  %v1179_v42 = vmin.f32 %v1147_v30, 6.0  ;;  %v1180_v58 = vmin.f32 %v1148_v45, 6.0  ;;  %v383_v17 = vmul.f32 %v3233_v9, %v1990_v4  ;;  %v2569_v57 = vld [vmem:[%s1997_s15 + $0x168] sm:$0xff] }
  0x62   : > { %v479_v43 = vmul.f32 %v3234_v26, %v1992_v5  ;;  %v893_v34 = vadd.f32 %v861_v0, %v795_v50  ;;  %v894_v49 = vadd.f32 %v862_v1, %v796_v54  ;;  %v480_v35 = vmul.f32 %v3235_v18, %v1992_v5  ;;  %3236 = vst [vmem:[#allocation31_spill] sm:$0xff] %v2569_v57  ;;  %v3240_v1 = vld [vmem:[#allocation37_spill] sm:$0xff]  ;;  %v2595_v18 = vld [vmem:[%s1997_s15 + $0x172] sm:$0xff] }
  0x63   : > { %v414_v25 = vadd.f32 %v382_v61, %v285_v32  ;;  %v1206_v60 = vpack.c.bf16 %v1180_v58, %v1179_v42  ;;  %v415_v36 = vadd.f32 %v383_v17, %v286_v63  ;;  %v577_v30 = vmul.f32 %v2341_v16, %v1999_v6  ;;  %v2574_v32 = vld [vmem:[%s1997_s15 + $0x170] sm:$0xff]  ;;  %3243 = vst [vmem:[#allocation36_spill] sm:$0xff] %v2595_v18 }
  0x64   : > { %v578_v45 = vmul.f32 %v2344_v14, %v1999_v6  ;;  %v990_v9 = vadd.f32 %v958_v59, %v893_v34  ;;  %v991_v26 = vadd.f32 %v959_v10, %v894_v49  ;;  %v674_v54 = vmul.f32 %v2351_v48, %v2001_v7  ;;  %3237 = vst [vmem:[#allocation32_spill] sm:$0xff] %v2574_v32  ;;  %v2577_v58 = vld [vmem:[%s1997_s15 + $0x169] sm:$0xff]  ;;  %v2580_v42 = vld [vmem:[%s1997_s15 + $0x171] sm:$0xff] }
  0x65   : > { %v511_v50 = vadd.f32 %v479_v43, %v414_v25  ;;  %3238 = vst [vmem:[#allocation33_spill] sm:$0xff] %v2577_v58  ;;  %1761 = vmatmul.msk.bf16.gmra.mxu1 %vm1237_vm0, %v1206_v60  ;;  %v512_v0 = vadd.f32 %v480_v35, %v415_v36  ;;  %v675_v63 = vmul.f32 %v3240_v1, %v2001_v7  ;;  %v3241_v43 = vld [vmem:[#allocation39_spill] sm:$0xff] }
  0x66   : > { %3239 = vst [vmem:[#allocation34_spill] sm:$0xff] %v2580_v42  ;;  %v771_v59 = vmul.f32 %v2364_v22, %v2006_v11  ;;  %v772_v10 = vmul.f32 %v3241_v43, %v2006_v11  ;;  %v2590_v61 = vld [vmem:[%s1997_s15 + $0x16a] sm:$0xff]  ;;  %v1087_v17 = vadd.f32 %v1055_v62, %v990_v9  ;;  %v1088_v34 = vadd.f32 %v1056_v41, %v991_v26 }
  0x67   : > { %3242 = vst [vmem:[#allocation35_spill] sm:$0xff] %v2590_v61  ;;  %v609_v49 = vadd.f32 %v577_v30, %v511_v50  ;;  %v869_v25 = vmul.f32 %v2569_v57, %v2008_v12  ;;  %v610_v36 = vadd.f32 %v578_v45, %v512_v0  ;;  %v870_v35 = vmul.f32 %v2574_v32, %v2008_v12 }
  0x68   : > { %v966_v60 = vmul.f32 %v2577_v58, %v2021_v20  ;;  %v967_v43 = vmul.f32 %v2580_v42, %v2021_v20  ;;  %v1123_v22 = vadd.f32 %v2206_v53, %v1087_v17  ;;  %v1124_v62 = vadd.f32 %v2206_v53, %v1088_v34 }
  0x69   : > { %v706_v41 = vadd.f32 %v674_v54, %v609_v49  ;;  %v1063_v30 = vmul.f32 %v2013_v13, %v2590_v61  ;;  %v707_v9 = vadd.f32 %v675_v63, %v610_v36  ;;  %v1064_v45 = vmul.f32 %v2013_v13, %v2595_v18 }
  0x6a   : > { %v263_v26 = vmul.f32 %v2057_v38, %v1988_v3  ;;  %v264_v50 = vmul.f32 %v2060_v39, %v1988_v3  ;;  %v1155_v0 = vmax.f32 %v1123_v22, 0.0  ;;  %v1156_v42 = vmax.f32 %v1124_v62, 0.0 }
  0x6b   : > { %v803_v58 = vadd.f32 %v771_v59, %v706_v41  ;;  %v360_v17 = vmul.f32 %v2063_v40, %v1990_v4  ;;  %v804_v54 = vadd.f32 %v772_v10, %v707_v9  ;;  %v361_v34 = vmul.f32 %v2070_v44, %v1990_v4  ;;  %v3244_v59 = vld [vmem:[#allocation40_spill] sm:$0xff]  ;;  %v3245_v40 = vld [vmem:[#allocation41_spill] sm:$0xff] }
  0x6c   : > { %v457_v63 = vmul.f32 %v2077_v46, %v1992_v5  ;;  %v458_v49 = vmul.f32 %v2080_v47, %v1992_v5  ;;  %v1187_v38 = vmin.f32 %v1155_v0, 6.0  ;;  %v1188_v36 = vmin.f32 %v1156_v42, 6.0  ;;  %v3246_v46 = vld [vmem:[#allocation42_spill] sm:$0xff] }
  0x6d   : > { %v901_v18 = vadd.f32 %v869_v25, %v803_v58  ;;  %v392_v39 = vadd.f32 %v360_v17, %v263_v26  ;;  %v902_v22 = vadd.f32 %v870_v35, %v804_v54  ;;  %v393_v62 = vadd.f32 %v361_v34, %v264_v50  ;;  %v3249_v54 = vld [vmem:[#allocation7_spill] sm:$0xff] }
  0x6e   : > { %v555_v41 = vmul.f32 %v3244_v59, %v1999_v6  ;;  %v556_v10 = vmul.f32 %v3245_v40, %v1999_v6  ;;  %v1210_v9 = vpack.c.bf16 %v1188_v36, %v1187_v38  ;;  %v652_v32 = vmul.f32 %v3246_v46, %v2001_v7  ;;  %v3250_v38 = vld [vmem:[#allocation8_spill] sm:$0xff] }
  0x6f   : > { %v998_v44 = vadd.f32 %v966_v60, %v901_v18  ;;  %v489_v61 = vadd.f32 %v457_v63, %v392_v39  ;;  %v999_v57 = vadd.f32 %v967_v43, %v902_v22  ;;  %v490_v47 = vadd.f32 %v458_v49, %v393_v62  ;;  %v3247_v18 = vld [vmem:[#allocation5_spill] sm:$0xff]  ;;  %v3248_v43 = vld [vmem:[#allocation6_spill] sm:$0xff] }
  0x70   : > { %v653_v58 = vmul.f32 %v2414_v51, %v2001_v7  ;;  %v749_v42 = vmul.f32 %v2417_v23, %v2006_v11  ;;  %1765 = vmatmul.msk.bf16.gmra.mxu2 %vm1237_vm0, %v1210_v9  ;;  %v750_v26 = vmul.f32 %v2420_v52, %v2006_v11  ;;  %v847_v60 = vmul.f32 %v2008_v12, %v3247_v18 }
  0x71   : > { %v1095_v25 = vadd.f32 %v1063_v30, %v998_v44  ;;  %v587_v35 = vadd.f32 %v555_v41, %v489_v61  ;;  %v1096_v50 = vadd.f32 %v1064_v45, %v999_v57  ;;  %v588_v0 = vadd.f32 %v556_v10, %v490_v47  ;;  %v3251_v30 = vld [vmem:[#allocation9_spill] sm:$0xff]  ;;  %v3252_v57 = vld [vmem:[#allocation10_spill] sm:$0xff] }
  0x72   : > { %v848_v17 = vmul.f32 %v2008_v12, %v3248_v43  ;;  %v944_v34 = vmul.f32 %v2021_v20, %v3249_v54  ;;  %v945_v61 = vmul.f32 %v2021_v20, %v3250_v38  ;;  %v1041_v36 = vmul.f32 %v2013_v13, %v3251_v30 }
  0x73   : > { %v1131_v63 = vadd.f32 %v2206_v53, %v1095_v25  ;;  %v684_v49 = vadd.f32 %v652_v32, %v587_v35  ;;  %v1132_v39 = vadd.f32 %v2206_v53, %v1096_v50  ;;  %v685_v22 = vadd.f32 %v653_v58, %v588_v0 }
  0x74   : > { %v1042_v45 = vmul.f32 %v2013_v13, %v3252_v57  ;;  %v271_v62 = vmul.f32 %v2151_v28, %v1988_v3  ;;  %v272_v32 = vmul.f32 %v2154_v29, %v1988_v3  ;;  %v368_v9 = vmul.f32 %v2157_v31, %v1990_v4 }
  0x75   : > { %v1163_v41 = vmax.f32 %v1131_v63, 0.0  ;;  %v781_v10 = vadd.f32 %v749_v42, %v684_v49  ;;  %v1164_v44 = vmax.f32 %v1132_v39, 0.0  ;;  %v782_v47 = vadd.f32 %v750_v26, %v685_v22  ;;  %v3253_v22 = vld [vmem:[#allocation13_spill] sm:$0xff] }
  0x76   : > { %v369_v25 = vmul.f32 %v2164_v55, %v1990_v4  ;;  %v465_v58 = vmul.f32 %v3216_v37, %v1992_v5  ;;  %v400_v50 = vadd.f32 %v368_v9, %v271_v62  ;;  %v466_v28 = vmul.f32 %v3217_v2, %v1992_v5  ;;  %v3256_v9 = vld [vmem:[#allocation16_spill] sm:$0xff] }
  0x77   : > { %v1195_v35 = vmin.f32 %v1163_v41, 6.0  ;;  %v879_v18 = vadd.f32 %v847_v60, %v781_v10  ;;  %v1196_v42 = vmin.f32 %v1164_v44, 6.0  ;;  %v880_v0 = vadd.f32 %v848_v17, %v782_v47  ;;  %v3255_v10 = vld [vmem:[#allocation15_spill] sm:$0xff] }
  0x78   : > { %v401_v29 = vadd.f32 %v369_v25, %v272_v32  ;;  %v563_v31 = vmul.f32 %v2457_v19, %v1999_v6  ;;  %v497_v26 = vadd.f32 %v465_v58, %v400_v50  ;;  %v564_v55 = vmul.f32 %v2460_v21, %v1999_v6 }
  0x79   : > { %v976_v43 = vadd.f32 %v944_v34, %v879_v18  ;;  %v660_v37 = vmul.f32 %v2465_v15, %v2001_v7  ;;  %v1214_v54 = vpack.c.bf16 %v1196_v42, %v1195_v35  ;;  %v977_v60 = vadd.f32 %v945_v61, %v880_v0  ;;  %v3254_v61 = vld [vmem:[#allocation14_spill] sm:$0xff] }
  0x7a   : > { %v498_v63 = vadd.f32 %v466_v28, %v401_v29  ;;  %v661_v2 = vmul.f32 %v2468_v24, %v2001_v7  ;;  %v595_v17 = vadd.f32 %v563_v31, %v497_v26  ;;  %v757_v38 = vmul.f32 %v2475_v27, %v2006_v11  ;;  %v3258_v35 = vld [vmem:[#allocation18_spill] sm:$0xff] }
  0x7b   : > { %v1073_v49 = vadd.f32 %v1041_v36, %v976_v43  ;;  %v758_v34 = vmul.f32 %v2478_v33, %v2006_v11  ;;  %1769 = vmatmul.msk.bf16.gmra.mxu3 %vm1237_vm0, %v1214_v54  ;;  %v1074_v30 = vadd.f32 %v1042_v45, %v977_v60  ;;  %v855_v57 = vmul.f32 %v2008_v12, %v3253_v22  ;;  %v3257_v45 = vld [vmem:[#allocation17_spill] sm:$0xff]  ;;  %v3264_v22 = vld [vmem:[#allocation12_spill] sm:$0xff] }
  0x7c   : > { %v596_v39 = vadd.f32 %v564_v55, %v498_v63  ;;  %v856_v62 = vmul.f32 %v2008_v12, %v3254_v61  ;;  %v692_v36 = vadd.f32 %v660_v37, %v595_v17  ;;  %v952_v32 = vmul.f32 %v2021_v20, %v3255_v10  ;;  %v3259_v43 = vld [vmem:[#allocation21_spill] sm:$0xff]  ;;  %v3260_v55 = vld [vmem:[#allocation22_spill] sm:$0xff] }
  0x7d   : > { %v1109_v41 = vadd.f32 %v2206_v53, %v1073_v49  ;;  %v953_v44 = vmul.f32 %v2021_v20, %v3256_v9  ;;  %v1110_v47 = vadd.f32 %v2206_v53, %v1074_v30  ;;  %v1049_v58 = vmul.f32 %v2013_v13, %v3257_v45  ;;  %v3266_v45 = vld [vmem:[#allocation20_spill] sm:$0xff] }
  0x7e   : > { %v693_v25 = vadd.f32 %v661_v2, %v596_v39  ;;  %v1050_v18 = vmul.f32 %v2013_v13, %v3258_v35  ;;  %v789_v28 = vadd.f32 %v757_v38, %v692_v36  ;;  %v279_v42 = vmul.f32 %v3218_v56, %v1988_v3  ;;  %v3261_v13 = vld [vmem:[#allocation23_spill] sm:$0xff]  ;;  %v3262_v2 = vld [vmem:[#allocation24_spill] sm:$0xff] }
  0x7f   : > { %v1141_v50 = vmax.f32 %v1109_v41, 0.0  ;;  %v280_v0 = vmul.f32 %v3219_v8, %v1988_v3  ;;  %v1142_v29 = vmax.f32 %v1110_v47, 0.0  ;;  %v376_v26 = vmul.f32 %v3259_v43, %v1990_v4  ;;  %v3265_v41 = vld [vmem:[#allocation19_spill] sm:$0xff] }
  0x80   : > { %v790_v31 = vadd.f32 %v758_v34, %v693_v25  ;;  %v377_v37 = vmul.f32 %v3260_v55, %v1990_v4  ;;  %v887_v60 = vadd.f32 %v855_v57, %v789_v28  ;;  %v473_v63 = vmul.f32 %v3261_v13, %v1992_v5  ;;  %v3263_v34 = vld [vmem:[#allocation11_spill] sm:$0xff] }
  0x81   : > { %v1173_v54 = vmin.f32 %v1141_v50, 6.0  ;;  %v474_v49 = vmul.f32 %v3262_v2, %v1992_v5  ;;  %v1174_v56 = vmin.f32 %v1142_v29, 6.0  ;;  %v408_v38 = vadd.f32 %v376_v26, %v279_v42  ;;  %v3267_v35 = vld [vmem:[#allocation43_spill] sm:$0xff]  ;;  %v3268_v50 = vld [vmem:[#allocation44_spill] sm:$0xff]  ;;  %v2725_v2 = vld [vmem:[%s3094_s1 + $0x8] ss:$0 sm:$0xff] }
  0x82   : > { %v888_v17 = vadd.f32 %v856_v62, %v790_v31  ;;  %v409_v8 = vadd.f32 %v377_v37, %v280_v0  ;;  %v984_v30 = vadd.f32 %v952_v32, %v887_v60  ;;  %v571_v39 = vmul.f32 %v3263_v34, %v1999_v6  ;;  %v3269_v31 = vld [vmem:[#allocation25_spill] sm:$0xff]  ;;  %v3271_v55 = vld [vmem:[#allocation27_spill] sm:$0xff] }
  0x83   : > { %v572_v61 = vmul.f32 %v3264_v22, %v1999_v6  ;;  %v668_v57 = vmul.f32 %v3265_v41, %v2001_v7  ;;  %v1203_v36 = vpack.c.bf16 %v1174_v56, %v1173_v54  ;;  %v505_v9 = vadd.f32 %v473_v63, %v408_v38  ;;  %v3272_v54 = vld [vmem:[#allocation28_spill] sm:$0xff]  ;;  %v3274_v38 = vld [vmem:[#allocation30_spill] sm:$0xff] }
  0x84   : > { %v985_v10 = vadd.f32 %v953_v44, %v888_v17  ;;  %v506_v47 = vadd.f32 %v474_v49, %v409_v8  ;;  %v1081_v25 = vadd.f32 %v1049_v58, %v984_v30  ;;  %v669_v62 = vmul.f32 %v3266_v45, %v2001_v7  ;;  %v3270_v58 = vld [vmem:[#allocation26_spill] sm:$0xff]  ;;  %v3273_v49 = vld [vmem:[#allocation29_spill] sm:$0xff] }
  0x85   : > { %v765_v32 = vmul.f32 %v3267_v35, %v2006_v11  ;;  %v766_v28 = vmul.f32 %v3268_v50, %v2006_v11  ;;  %1758 = vmatmul.msk.bf16.gmra.mxu0 %vm1237_vm0, %v1203_v36  ;;  %v603_v0 = vadd.f32 %v571_v39, %v505_v9  ;;  %v863_v44 = vmul.f32 %v2008_v12, %v3269_v31 }
  0x86   : > { %v1082_v42 = vadd.f32 %v1050_v18, %v985_v10  ;;  %v604_v29 = vadd.f32 %v572_v61, %v506_v47  ;;  %v1117_v43 = vadd.f32 %v2206_v53, %v1081_v25  ;;  %v864_v26 = vmul.f32 %v2008_v12, %v3270_v58  ;;  %v3275_v25 = vld [vmem:[#allocation38_spill] sm:$0xff]  ;;  %v3279_v58 = vld [vmem:[#allocation33_spill] sm:$0xff] }
  0x87   : > { %v960_v37 = vmul.f32 %v2021_v20, %v3271_v55  ;;  %v961_v60 = vmul.f32 %v2021_v20, %v3272_v54  ;;  %v700_v63 = vadd.f32 %v668_v57, %v603_v0  ;;  %v1057_v56 = vmul.f32 %v2725_v2, %v3273_v49  ;;  %v2750_v54 = vld [vmem:[%s1997_s15 + $0x180] sm:$0xff] }
  0x88   : > { %v1118_v13 = vadd.f32 %v2206_v53, %v1082_v42  ;;  %v701_v18 = vadd.f32 %v669_v62, %v604_v29  ;;  %v1149_v17 = vmax.f32 %v1117_v43, 0.0  ;;  %v1058_v8 = vmul.f32 %v2725_v2, %v3274_v38  ;;  %v2756_v49 = vld [vmem:[%s1997_s15 + $0x181] sm:$0xff] }
  0x89   : > { %v287_v30 = vmul.f32 %v2341_v16, %v1988_v3  ;;  %v288_v39 = vmul.f32 %v2344_v14, %v1988_v3  ;;  %v797_v57 = vadd.f32 %v765_v32, %v700_v63  ;;  %v384_v10 = vmul.f32 %v2351_v48, %v1990_v4  ;;  %v3276_v16 = vld [vmem:[#allocation39_spill] sm:$0xff] }
  0x8a   : > { %v1150_v61 = vmax.f32 %v1118_v13, 0.0  ;;  %v798_v36 = vadd.f32 %v766_v28, %v701_v18  ;;  %v1181_v9 = vmin.f32 %v1149_v17, 6.0  ;;  %v385_v47 = vmul.f32 %v3240_v1, %v1990_v4  ;;  %v3277_v48 = vld [vmem:[#allocation31_spill] sm:$0xff]  ;;  %v3278_v1 = vld [vmem:[#allocation32_spill] sm:$0xff] }
  0x8b   : > { %v481_v62 = vmul.f32 %v3275_v25, %v1992_v5  ;;  %v482_v42 = vmul.f32 %v3276_v16, %v1992_v5  ;;  %v895_v0 = vadd.f32 %v863_v44, %v797_v57  ;;  %v416_v28 = vadd.f32 %v384_v10, %v287_v30  ;;  %v2759_v17 = vld [vmem:[%s1997_s15 + $0x189] sm:$0xff] }
  0x8c   : > { %v1182_v14 = vmin.f32 %v1150_v61, 6.0  ;;  %v896_v32 = vadd.f32 %v864_v26, %v798_v36  ;;  %v417_v29 = vadd.f32 %v385_v47, %v288_v39  ;;  %v579_v31 = vmul.f32 %v3277_v48, %v1999_v6  ;;  %v2753_v26 = vld [vmem:[%s1997_s15 + $0x188] sm:$0xff]  ;;  %v3281_v61 = vld [vmem:[#allocation35_spill] sm:$0xff]  ;;  %v3282_v36 = vld [vmem:[#allocation36_spill] sm:$0xff] }
  0x8d   : > { %v580_v43 = vmul.f32 %v3278_v1, %v1999_v6  ;;  %v676_v55 = vmul.f32 %v3279_v58, %v2001_v7  ;;  %v992_v63 = vadd.f32 %v960_v37, %v895_v0  ;;  %v513_v44 = vadd.f32 %v481_v62, %v416_v28  ;;  %v3280_v30 = vld [vmem:[#allocation34_spill] sm:$0xff] }
  0x8e   : > { %v1207_v13 = vpack.c.bf16 %v1182_v14, %v1181_v9  ;;  %v993_v18 = vadd.f32 %v961_v60, %v896_v32  ;;  %v514_v38 = vadd.f32 %v482_v42, %v417_v29  ;;  %v677_v39 = vmul.f32 %v3280_v30, %v2001_v7  ;;  %v2768_v37 = vld [vmem:[%s1997_s15 + $0x182] sm:$0xff]  ;;  %v2774_v62 = vld [vmem:[%s1997_s15 + $0x18a] sm:$0xff] }
  0x8f   : > { %v773_v57 = vmul.f32 %v3281_v61, %v2006_v11  ;;  %v774_v10 = vmul.f32 %v3282_v36, %v2006_v11  ;;  %3283 = vst [vmem:[#allocation37_spill] sm:$0xff] %v2768_v37  ;;  %v1089_v60 = vadd.f32 %v1057_v56, %v992_v63  ;;  %v611_v47 = vadd.f32 %v579_v31, %v513_v44  ;;  %v1562_v44 = vld [vmem:[%s1997_s15 + $0x60] sm:$0xff] }
  0x90   : > { %1762 = vmatmul.msk.bf16.gmra.mxu1 %vm1237_vm0, %v1207_v13  ;;  %v1090_v9 = vadd.f32 %v1058_v8, %v993_v18  ;;  %v871_v25 = vmul.f32 %v2750_v54, %v2008_v12  ;;  %3284 = vst [vmem:[#allocation40_spill] sm:$0xff] %v2774_v62  ;;  %v612_v16 = vadd.f32 %v580_v43, %v514_v38  ;;  %v1563_v38 = vld [vmem:[%s1997_s15 + $0x68] sm:$0xff] }
  0x91   : > { %v872_v42 = vmul.f32 %v2753_v26, %v2008_v12  ;;  %v968_v14 = vmul.f32 %v2756_v49, %v2021_v20  ;;  %v969_v0 = vmul.f32 %v2759_v17, %v2021_v20  ;;  %v1125_v56 = vadd.f32 %v2206_v53, %v1089_v60 }
  0x92   : > { %v1126_v8 = vadd.f32 %v2206_v53, %v1090_v9  ;;  %v708_v32 = vadd.f32 %v676_v55, %v611_v47  ;;  %v1065_v28 = vmul.f32 %v2725_v2, %v2768_v37  ;;  %v709_v29 = vadd.f32 %v677_v39, %v612_v16  ;;  %v1594_v9 = vld [vmem:[%s1997_s15 + $0x61] sm:$0xff] }
  0x93   : > { %v1066_v31 = vmul.f32 %v2725_v2, %v2774_v62  ;;  %v265_v43 = vmul.f32 %v3244_v59, %v1988_v3  ;;  %v266_v13 = vmul.f32 %v3245_v40, %v1988_v3  ;;  %v1157_v63 = vmax.f32 %v1125_v56, 0.0  ;;  %v1595_v56 = vld [vmem:[%s1997_s15 + $0x69] sm:$0xff]  ;;  %v1658_v62 = vld [vmem:[%s1997_s15 + $0x78] sm:$0xff] }
  0x94   : > { %v1158_v18 = vmax.f32 %v1126_v8, 0.0  ;;  %v805_v53 = vadd.f32 %v773_v57, %v708_v32  ;;  %v362_v55 = vmul.f32 %v3246_v46, %v1990_v4  ;;  %v806_v39 = vadd.f32 %v774_v10, %v709_v29  ;;  %v1626_v8 = vld [vmem:[%s1997_s15 + $0x62] sm:$0xff]  ;;  %v1627_v29 = vld [vmem:[%s1997_s15 + $0x6a] sm:$0xff] }
  0x95   : > { %v363_v60 = vmul.f32 %v2414_v51, %v1990_v4  ;;  %v459_v59 = vmul.f32 %v2417_v23, %v1992_v5  ;;  %v460_v40 = vmul.f32 %v2420_v52, %v1992_v5  ;;  %v1189_v47 = vmin.f32 %v1157_v63, 6.0 }
  0x96   : > { %v1190_v57 = vmin.f32 %v1158_v18, 6.0  ;;  %v903_v46 = vadd.f32 %v871_v25, %v805_v53  ;;  %v394_v16 = vadd.f32 %v362_v55, %v265_v43  ;;  %v904_v10 = vadd.f32 %v872_v42, %v806_v39  ;;  %v1659_v25 = vld [vmem:[%s1997_s15 + $0x80] sm:$0xff] }
  0x97   : > { %v395_v32 = vadd.f32 %v363_v60, %v266_v13  ;;  %v557_v51 = vmul.f32 %v1562_v44, %v1999_v6  ;;  %v558_v23 = vmul.f32 %v1563_v38, %v1999_v6  ;;  %v654_v18 = vmul.f32 %v1594_v9, %v2001_v7  ;;  %v1690_v43 = vld [vmem:[%s1997_s15 + $0x79] sm:$0xff]  ;;  %v1691_v39 = vld [vmem:[%s1997_s15 + $0x81] sm:$0xff] }
  0x98   : > { %v1211_v52 = vpack.c.bf16 %v1190_v57, %v1189_v47  ;;  %v1000_v37 = vadd.f32 %v968_v14, %v903_v46  ;;  %v491_v63 = vadd.f32 %v459_v59, %v394_v16  ;;  %v1001_v53 = vadd.f32 %v969_v0, %v904_v10  ;;  %v1722_v44 = vld [vmem:[%s1997_s15 + $0x7a] sm:$0xff]  ;;  %v1723_v47 = vld [vmem:[%s1997_s15 + $0x82] sm:$0xff] }
  0x99   : > { %v492_v55 = vadd.f32 %v460_v40, %v395_v32  ;;  %v655_v42 = vmul.f32 %v1595_v56, %v2001_v7  ;;  %v751_v13 = vmul.f32 %v1626_v8, %v2006_v11  ;;  %v752_v14 = vmul.f32 %v1627_v29, %v2006_v11  ;;  %v2825_v46 = vld [vmem:[%s3095_s2] ss:$0 sm:$0xff] }
  0x9a   : > { %1766 = vmatmul.msk.bf16.gmra.mxu2 %vm1237_vm0, %v1211_v52  ;;  %v1097_v38 = vadd.f32 %v1065_v28, %v1000_v37  ;;  %v589_v60 = vadd.f32 %v557_v51, %v491_v63  ;;  %v849_v59 = vmul.f32 %v1658_v62, %v2008_v12  ;;  %v1098_v9 = vadd.f32 %v1066_v31, %v1001_v53  ;;  %v1570_v52 = vld [vmem:[%s1997_s15 + $0xc0] sm:$0xff] }
  0x9b   : > { %v590_v57 = vadd.f32 %v558_v23, %v492_v55  ;;  %v850_v0 = vmul.f32 %v1659_v25, %v2008_v12  ;;  %v946_v40 = vmul.f32 %v1690_v43, %v2021_v20  ;;  %v947_v16 = vmul.f32 %v1691_v39, %v2021_v20  ;;  %v1571_v43 = vld [vmem:[%s1997_s15 + $0xc8] sm:$0xff] }
  0x9c   : > { %v1133_v37 = vadd.f32 %v2825_v46, %v1097_v38  ;;  %v686_v28 = vadd.f32 %v654_v18, %v589_v60  ;;  %v1043_v62 = vmul.f32 %v2725_v2, %v1722_v44  ;;  %v1134_v31 = vadd.f32 %v2825_v46, %v1098_v9  ;;  %v1602_v53 = vld [vmem:[%s1997_s15 + $0xc1] sm:$0xff] }
  0x9d   : > { %v687_v56 = vadd.f32 %v655_v42, %v590_v57  ;;  %v1044_v8 = vmul.f32 %v2725_v2, %v1723_v47  ;;  %v273_v10 = vmul.f32 %v2457_v19, %v1988_v3  ;;  %v274_v23 = vmul.f32 %v2460_v21, %v1988_v3  ;;  %v1634_v60 = vld [vmem:[%s1997_s15 + $0xc2] sm:$0xff]  ;;  %v1666_v57 = vld [vmem:[%s1997_s15 + $0xd8] sm:$0xff] }
  0x9e   : > { %v1165_v32 = vmax.f32 %v1133_v37, 0.0  ;;  %v783_v51 = vadd.f32 %v751_v13, %v686_v28  ;;  %v370_v29 = vmul.f32 %v2465_v15, %v1990_v4  ;;  %v1166_v63 = vmax.f32 %v1134_v31, 0.0  ;;  %v1603_v13 = vld [vmem:[%s1997_s15 + $0xc9] sm:$0xff] }
  0x9f   : > { %v784_v18 = vadd.f32 %v752_v14, %v687_v56  ;;  %v371_v25 = vmul.f32 %v2468_v24, %v1990_v4  ;;  %v467_v19 = vmul.f32 %v2475_v27, %v1992_v5  ;;  %v468_v15 = vmul.f32 %v2478_v33, %v1992_v5  ;;  %v1635_v27 = vld [vmem:[%s1997_s15 + $0xca] sm:$0xff]  ;;  %v1667_v33 = vld [vmem:[%s1997_s15 + $0xe0] sm:$0xff] }
  0xa0   : > { %v1197_v55 = vmin.f32 %v1165_v32, 6.0  ;;  %v881_v21 = vadd.f32 %v849_v59, %v783_v51  ;;  %v402_v42 = vadd.f32 %v370_v29, %v273_v10  ;;  %v1198_v39 = vmin.f32 %v1166_v63, 6.0  ;;  %v1698_v56 = vld [vmem:[%s1997_s15 + $0xd9] sm:$0xff]  ;;  %v1699_v10 = vld [vmem:[%s1997_s15 + $0xe1] sm:$0xff] }
  0xa1   : > { %v882_v44 = vadd.f32 %v850_v0, %v784_v18  ;;  %v403_v38 = vadd.f32 %v371_v25, %v274_v23  ;;  %v565_v24 = vmul.f32 %v1570_v52, %v1999_v6  ;;  %v566_v59 = vmul.f32 %v1571_v43, %v1999_v6  ;;  %v1730_v29 = vld [vmem:[%s1997_s15 + $0xda] sm:$0xff]  ;;  %v1731_v52 = vld [vmem:[%s1997_s15 + $0xe2] sm:$0xff] }
  0xa2   : > { %v978_v14 = vadd.f32 %v946_v40, %v881_v21  ;;  %v499_v47 = vadd.f32 %v467_v19, %v402_v42  ;;  %v662_v9 = vmul.f32 %v1602_v53, %v2001_v7  ;;  %v1215_v37 = vpack.c.bf16 %v1198_v39, %v1197_v55 }
  0xa3   : > { %v979_v28 = vadd.f32 %v947_v16, %v882_v44  ;;  %v500_v31 = vadd.f32 %v468_v15, %v403_v38  ;;  %v663_v0 = vmul.f32 %v1603_v13, %v2001_v7  ;;  %v759_v40 = vmul.f32 %v1634_v60, %v2006_v11 }
  0xa4   : > { %v1075_v32 = vadd.f32 %v1043_v62, %v978_v14  ;;  %v597_v51 = vadd.f32 %v565_v24, %v499_v47  ;;  %v760_v23 = vmul.f32 %v1635_v27, %v2006_v11  ;;  %1770 = vmatmul.msk.bf16.gmra.mxu3 %vm1237_vm0, %v1215_v37  ;;  %v857_v25 = vmul.f32 %v1666_v57, %v2008_v12  ;;  %v1578_v14 = vld [vmem:[%s1997_s15 + $0x120] sm:$0xff]  ;;  %v1579_v47 = vld [vmem:[%s1997_s15 + $0x128] sm:$0xff] }
  0xa5   : > { %v1076_v63 = vadd.f32 %v1044_v8, %v979_v28  ;;  %v598_v18 = vadd.f32 %v566_v59, %v500_v31  ;;  %v858_v16 = vmul.f32 %v1667_v33, %v2008_v12  ;;  %v954_v62 = vmul.f32 %v1698_v56, %v2021_v20  ;;  %v1610_v59 = vld [vmem:[%s1997_s15 + $0x121] sm:$0xff] }
  0xa6   : > { %v1111_v19 = vadd.f32 %v2825_v46, %v1075_v32  ;;  %v694_v43 = vadd.f32 %v662_v9, %v597_v51  ;;  %v955_v53 = vmul.f32 %v1699_v10, %v2021_v20  ;;  %v1051_v8 = vmul.f32 %v2725_v2, %v1730_v29  ;;  %v1642_v31 = vld [vmem:[%s1997_s15 + $0x122] sm:$0xff]  ;;  %v1674_v51 = vld [vmem:[%s1997_s15 + $0x138] sm:$0xff] }
  0xa7   : > { %v1112_v55 = vadd.f32 %v2825_v46, %v1076_v63  ;;  %v695_v21 = vadd.f32 %v663_v0, %v598_v18  ;;  %v1052_v42 = vmul.f32 %v2725_v2, %v1731_v52  ;;  %v281_v39 = vmul.f32 %v3263_v34, %v1988_v3  ;;  %v1643_v0 = vld [vmem:[%s1997_s15 + $0x12a] sm:$0xff]  ;;  %v1675_v52 = vld [vmem:[%s1997_s15 + $0x140] sm:$0xff] }
  0xa8   : > { %v1143_v15 = vmax.f32 %v1111_v19, 0.0  ;;  %v791_v13 = vadd.f32 %v759_v40, %v694_v43  ;;  %v282_v44 = vmul.f32 %v3264_v22, %v1988_v3  ;;  %v378_v60 = vmul.f32 %v3265_v41, %v1990_v4  ;;  %v1706_v63 = vld [vmem:[%s1997_s15 + $0x139] sm:$0xff]  ;;  %v1707_v18 = vld [vmem:[%s1997_s15 + $0x141] sm:$0xff] }
  0xa9   : > { %v1144_v38 = vmax.f32 %v1112_v55, 0.0  ;;  %v792_v24 = vadd.f32 %v760_v23, %v695_v21  ;;  %v379_v27 = vmul.f32 %v3266_v45, %v1990_v4  ;;  %v475_v22 = vmul.f32 %v3267_v35, %v1992_v5  ;;  %v1611_v45 = vld [vmem:[%s1997_s15 + $0x129] sm:$0xff] }
  0xaa   : > { %v1175_v9 = vmin.f32 %v1143_v15, 6.0  ;;  %v889_v34 = vadd.f32 %v857_v25, %v791_v13  ;;  %v476_v57 = vmul.f32 %v3268_v50, %v1992_v5  ;;  %v410_v41 = vadd.f32 %v378_v60, %v281_v39  ;;  %v1739_v13 = vld [vmem:[%s1997_s15 + $0x142] sm:$0xff] }
  0xab   : > { %v1176_v33 = vmin.f32 %v1144_v38, 6.0  ;;  %v890_v37 = vadd.f32 %v858_v16, %v792_v24  ;;  %v411_v28 = vadd.f32 %v379_v27, %v282_v44  ;;  %v573_v10 = vmul.f32 %v1578_v14, %v1999_v6 }
  0xac   : > { %v986_v56 = vadd.f32 %v954_v62, %v889_v34  ;;  %v574_v32 = vmul.f32 %v1579_v47, %v1999_v6  ;;  %v670_v35 = vmul.f32 %v1610_v59, %v2001_v7  ;;  %v507_v23 = vadd.f32 %v475_v22, %v410_v41  ;;  %v1738_v62 = vld [vmem:[%s1997_s15 + $0x13a] sm:$0xff] }
  0xad   : > { %v1204_v50 = vpack.c.bf16 %v1176_v33, %v1175_v9  ;;  %v987_v40 = vadd.f32 %v955_v53, %v890_v37  ;;  %v508_v29 = vadd.f32 %v476_v57, %v411_v28  ;;  %v671_v16 = vmul.f32 %v1611_v45, %v2001_v7 }
  0xae   : > { %v1083_v25 = vadd.f32 %v1051_v8, %v986_v56  ;;  %v767_v19 = vmul.f32 %v1642_v31, %v2006_v11  ;;  %v768_v43 = vmul.f32 %v1643_v0, %v2006_v11  ;;  %v605_v21 = vadd.f32 %v573_v10, %v507_v23  ;;  %v3285_v23 = vld [vmem:[#allocation37_spill] sm:$0xff] }
  0xaf   : > { %1759 = vmatmul.msk.bf16.gmra.mxu0 %vm1237_vm0, %v1204_v50  ;;  %v1084_v55 = vadd.f32 %v1052_v42, %v987_v40  ;;  %v606_v15 = vadd.f32 %v574_v32, %v508_v29  ;;  %v865_v53 = vmul.f32 %v1674_v51, %v2008_v12  ;;  %v866_v44 = vmul.f32 %v1675_v52, %v2008_v12  ;;  %v1682_v32 = vld [vmem:[%s1997_s15 + $0x198] sm:$0xff]  ;;  %v1715_v52 = vld [vmem:[%s1997_s15 + $0x1a1] sm:$0xff] }
  0xb0   : > { %v1119_v39 = vadd.f32 %v2825_v46, %v1083_v25  ;;  %v962_v8 = vmul.f32 %v1706_v63, %v2021_v20  ;;  %v963_v38 = vmul.f32 %v1707_v18, %v2021_v20  ;;  %v702_v60 = vadd.f32 %v670_v35, %v605_v21  ;;  %v1683_v35 = vld [vmem:[%s1997_s15 + $0x1a0] sm:$0xff] }
  0xb1   : > { %v1120_v24 = vadd.f32 %v2825_v46, %v1084_v55  ;;  %v703_v27 = vadd.f32 %v671_v16, %v606_v15  ;;  %v1059_v14 = vmul.f32 %v2725_v2, %v1738_v62  ;;  %v1060_v47 = vmul.f32 %v2725_v2, %v1739_v13  ;;  %v1746_v63 = vld [vmem:[%s1997_s15 + $0x19a] sm:$0xff] }
  0xb2   : > { %v1151_v42 = vmax.f32 %v1119_v39, 0.0  ;;  %v289_v59 = vmul.f32 %v3277_v48, %v1988_v3  ;;  %v290_v9 = vmul.f32 %v3278_v1, %v1988_v3  ;;  %v799_v22 = vadd.f32 %v767_v19, %v702_v60 }
  0xb3   : > { %v1152_v34 = vmax.f32 %v1120_v24, 0.0  ;;  %v800_v57 = vadd.f32 %v768_v43, %v703_v27  ;;  %v386_v33 = vmul.f32 %v3279_v58, %v1990_v4  ;;  %v387_v41 = vmul.f32 %v3280_v30, %v1990_v4  ;;  %v1295_v0 = vpop.f32.mrf.mxu0 }
  0xb4   : > { %v1183_v37 = vmin.f32 %v1151_v42, 6.0  ;;  %v483_v28 = vmul.f32 %v3281_v61, %v1992_v5  ;;  %v484_v48 = vmul.f32 %v3282_v36, %v1992_v5  ;;  %v897_v3 = vadd.f32 %v865_v53, %v799_v22 }
  0xb5   : > { %v1184_v45 = vmin.f32 %v1152_v34, 6.0  ;;  %v898_v1 = vadd.f32 %v866_v44, %v800_v57  ;;  %v418_v31 = vadd.f32 %v386_v33, %v289_v59  ;;  %v419_v56 = vadd.f32 %v387_v41, %v290_v9 }
  0xb6   : > { %v581_v58 = vmul.f32 %v2750_v54, %v1999_v6  ;;  %v582_v4 = vmul.f32 %v2753_v26, %v1999_v6  ;;  %v678_v30 = vmul.f32 %v2756_v49, %v2001_v7  ;;  %v994_v5 = vadd.f32 %v962_v8, %v897_v3  ;;  %v1714_v54 = vld [vmem:[%s1997_s15 + $0x199] sm:$0xff]  ;;  %v1747_v8 = vld [vmem:[%s1997_s15 + $0x1a2] sm:$0xff] }
  0xb7   : > { %v1208_v61 = vpack.c.bf16 %v1184_v45, %v1183_v37  ;;  %v995_v36 = vadd.f32 %v963_v38, %v898_v1  ;;  %v515_v10 = vadd.f32 %v483_v28, %v418_v31  ;;  %v516_v51 = vadd.f32 %v484_v48, %v419_v56  ;;  %v2936_v6 = vld [vmem:[%s3097_s4] ss:$0 sm:$0xff] }
  0xb8   : > { %v679_v50 = vmul.f32 %v2759_v17, %v2001_v7  ;;  %v1091_v26 = vadd.f32 %v1059_v14, %v994_v5  ;;  %v775_v29 = vmul.f32 %v3285_v23, %v2006_v11  ;;  %v3286_v7 = vld [vmem:[#allocation40_spill] sm:$0xff]  ;;  %v873_v25 = vmul.f32 %v1682_v32, %v2008_v12 }
  0xb9   : > { %1763 = vmatmul.msk.bf16.gmra.mxu1 %vm1237_vm0, %v1208_v61  ;;  %v1092_v49 = vadd.f32 %v1060_v47, %v995_v36  ;;  %v613_v40 = vadd.f32 %v581_v58, %v515_v10  ;;  %v614_v18 = vadd.f32 %v582_v4, %v516_v51  ;;  %v776_v17 = vmul.f32 %v3286_v7, %v2006_v11 }
  0xba   : > { %v874_v16 = vmul.f32 %v1683_v35, %v2008_v12  ;;  %v1127_v19 = vadd.f32 %v2825_v46, %v1091_v26  ;;  %v970_v55 = vmul.f32 %v1714_v54, %v2021_v20  ;;  %v1315_v21 = vpop.f32.mrf.mxu1  ;;  %v971_v53 = vmul.f32 %v1715_v52, %v2021_v20 }
  0xbb   : > { %v1128_v43 = vadd.f32 %v2825_v46, %v1092_v49  ;;  %v710_v62 = vadd.f32 %v678_v30, %v613_v40  ;;  %v711_v15 = vadd.f32 %v679_v50, %v614_v18  ;;  %v1067_v13 = vmul.f32 %v2725_v2, %v1746_v63  ;;  %v1297_v24 = vpop.f32.mrf.mxu0 }
  0xbc   : > { %v1296_v11 = vadd.f32 %v2936_v6, %v1295_v0  ;;  %v1159_v39 = vmax.f32 %v1127_v19, 0.0  ;;  %v1316_v38 = vadd.f32 %v2936_v6, %v1315_v21  ;;  %v1298_v14 = vadd.f32 %v2936_v6, %v1297_v24 }
  0xbd   : > { %v1160_v44 = vmax.f32 %v1128_v43, 0.0  ;;  %v807_v12 = vadd.f32 %v775_v29, %v710_v62  ;;  %v808_v60 = vadd.f32 %v776_v17, %v711_v15  ;;  %v1068_v34 = vmul.f32 %v2725_v2, %v1747_v8 }
  0xbe   : > { %v1375_v27 = vmax.f32 %v1296_v11, 0.0  ;;  %v1191_v42 = vmin.f32 %v1159_v39, 6.0  ;;  %v1383_v59 = vmax.f32 %v1316_v38, 0.0  ;;  %v1376_v57 = vmax.f32 %v1298_v14, 0.0 }
  0xbf   : > { %v1192_v20 = vmin.f32 %v1160_v44, 6.0  ;;  %v905_v47 = vadd.f32 %v873_v25, %v807_v12  ;;  %v906_v9 = vadd.f32 %v874_v16, %v808_v60 }
  0xc0   : > { %v1407_v22 = vmin.f32 %v1375_v27, 6.0  ;;  %v1415_v41 = vmin.f32 %v1383_v59, 6.0  ;;  %v1408_v48 = vmin.f32 %v1376_v57, 6.0 }
  0xc1   : > { %v1212_v33 = vpack.c.bf16 %v1192_v20, %v1191_v42  ;;  %v1002_v37 = vadd.f32 %v970_v55, %v905_v47  ;;  %v1003_v28 = vadd.f32 %v971_v53, %v906_v9 }
  0xc2   : > { %1440 = vst.msk [vmem:[%s2960_s12] sm:$0xff] %vm1439_vm1, %v1407_v22  ;;  %v1317_v2 = vpop.f32.mrf.mxu1 }
  0xc3   : > { %1767 = vmatmul.msk.bf16.gmra.mxu2 %vm1237_vm0, %v1212_v33  ;;  %v1099_v45 = vadd.f32 %v1067_v13, %v1002_v37  ;;  %1448 = vst.msk [vmem:[%s2960_s12 + $0x40] sm:$0xff] %vm1439_vm1, %v1415_v41  ;;  %v1100_v3 = vadd.f32 %v1068_v34, %v1003_v28  ;;  %v1318_v1 = vadd.f32 %v2936_v6, %v1317_v2 }
  0xc4   : > { %1441 = vst.msk [vmem:[%s2960_s12 + $0x8] sm:$0xff] %vm1439_vm1, %v1408_v48 }
  0xc5   : > { %v1135_v31 = vadd.f32 %v2825_v46, %v1099_v45  ;;  %v1136_v0 = vadd.f32 %v2825_v46, %v1100_v3  ;;  %v1384_v56 = vmax.f32 %v1318_v1, 0.0 }
  0xc7   : > { %v1167_v58 = vmax.f32 %v1135_v31, 0.0  ;;  %v1168_v4 = vmax.f32 %v1136_v0, 0.0  ;;  %v1416_v30 = vmin.f32 %v1384_v56, 6.0 }
  0xc8   : > { %v1335_v5 = vpop.f32.mrf.mxu2 }
  0xc9   : > { %v1199_v61 = vmin.f32 %v1167_v58, 6.0  ;;  %v1200_v36 = vmin.f32 %v1168_v4, 6.0  ;;  %v1336_v10 = vadd.f32 %v2936_v6, %v1335_v5  ;;  %1449 = vst.msk [vmem:[%s2960_s12 + $0x48] sm:$0xff] %vm1439_vm1, %v1416_v30 }
  0xcb   : > { %v1216_v32 = vpack.c.bf16 %v1200_v36, %v1199_v61  ;;  %v1391_v35 = vmax.f32 %v1336_v10, 0.0 }
  0xcd   : > { %1771 = vmatmul.msk.bf16.gmra.mxu3 %vm1237_vm0, %v1216_v32  ;;  %v1423_v51 = vmin.f32 %v1391_v35, 6.0 }
  0xcf   : > { %1456 = vst.msk [vmem:[%s2960_s12 + $0x80] sm:$0xff] %vm1439_vm1, %v1423_v51 }
  0xd0   : > { %v1337_v46 = vpop.f32.mrf.mxu2 }
  0xd1   : > { %v1338_v50 = vadd.f32 %v2936_v6, %v1337_v46 }
  0xd3   : > { %v1392_v54 = vmax.f32 %v1338_v50, 0.0 }
  0xd5   : > { %v1355_v26 = vpop.f32.mrf.mxu3  ;;  %v1424_v49 = vmin.f32 %v1392_v54, 6.0 }
  0xd6   : > { %v1356_v40 = vadd.f32 %v2936_v6, %v1355_v26 }
  0xd7   : > { %1457 = vst.msk [vmem:[%s2960_s12 + $0x88] sm:$0xff] %vm1439_vm1, %v1424_v49 }
  0xd8   : > { %v1399_v23 = vmax.f32 %v1356_v40, 0.0 }
  0xd9   : > { %v1300_v29 = vpop.f32.mrf.mxu0 }
  0xda   : > { %v1431_v52 = vmin.f32 %v1399_v23, 6.0  ;;  %v1301_v63 = vadd.f32 %v2936_v6, %v1300_v29 }
  0xdc   : > { %1464 = vst.msk [vmem:[%s2960_s12 + $0xc0] sm:$0xff] %vm1439_vm1, %v1431_v52  ;;  %v1377_v18 = vmax.f32 %v1301_v63, 0.0 }
  0xdd   : > { %v1357_v7 = vpop.f32.mrf.mxu3 }
  0xde   : > { %v1358_v17 = vadd.f32 %v2936_v6, %v1357_v7  ;;  %v1409_v25 = vmin.f32 %v1377_v18, 6.0 }
  0xe0   : > { %v1400_v16 = vmax.f32 %v1358_v17, 0.0  ;;  %1442 = vst.msk [vmem:[%s2960_s12 + $0x10] sm:$0xff] %vm1439_vm1, %v1409_v25 }
  0xe1   : > { %v1302_v21 = vpop.f32.mrf.mxu0 }
  0xe2   : > { %v1432_v19 = vmin.f32 %v1400_v16, 6.0  ;;  %v1320_v43 = vpop.f32.mrf.mxu1  ;;  %v1303_v15 = vadd.f32 %v2936_v6, %v1302_v21 }
  0xe3   : > { %v1321_v62 = vadd.f32 %v2936_v6, %v1320_v43 }
  0xe4   : > { %1465 = vst.msk [vmem:[%s2960_s12 + $0xc8] sm:$0xff] %vm1439_vm1, %v1432_v19  ;;  %v1378_v13 = vmax.f32 %v1303_v15, 0.0 }
  0xe5   : > { %v1385_v55 = vmax.f32 %v1321_v62, 0.0 }
  0xe6   : > { %v1410_v11 = vmin.f32 %v1378_v13, 6.0 }
  0xe7   : > { %v1417_v53 = vmin.f32 %v1385_v55, 6.0 }
  0xe8   : > { %1443 = vst.msk [vmem:[%s2960_s12 + $0x18] sm:$0xff] %vm1439_vm1, %v1410_v11 }
  0xe9   : > { %1450 = vst.msk [vmem:[%s2960_s12 + $0x50] sm:$0xff] %vm1439_vm1, %v1417_v53 }
  0xea   : > { %v1322_v39 = vpop.f32.mrf.mxu1 }
  0xeb   : > { %v1323_v44 = vadd.f32 %v2936_v6, %v1322_v39 }
  0xed   : > { %v1386_v12 = vmax.f32 %v1323_v44, 0.0 }
  0xef   : > { %v1418_v8 = vmin.f32 %v1386_v12, 6.0 }
  0xf1   : > { %1451 = vst.msk [vmem:[%s2960_s12 + $0x58] sm:$0xff] %vm1439_vm1, %v1418_v8 }
  0xf3   : > { %v1340_v38 = vpop.f32.mrf.mxu2 }
  0xf4   : > { %v1341_v24 = vadd.f32 %v2936_v6, %v1340_v38 }
  0xf6   : > { %v1393_v60 = vmax.f32 %v1341_v24, 0.0 }
  0xf8   : > { %v1425_v27 = vmin.f32 %v1393_v60, 6.0 }
  0xfa   : > { %1458 = vst.msk [vmem:[%s2960_s12 + $0x90] sm:$0xff] %vm1439_vm1, %v1425_v27 }
  0xfb   : > { %v1342_v14 = vpop.f32.mrf.mxu2 }
  0xfc   : > { %v1343_v42 = vadd.f32 %v2936_v6, %v1342_v14 }
  0xfe   : > { %v1360_v20 = vpop.f32.mrf.mxu3  ;;  %v1394_v47 = vmax.f32 %v1343_v42, 0.0 }
  0xff   : > { %v1361_v59 = vadd.f32 %v2936_v6, %v1360_v20 }
 0x100   : > { %v1426_v9 = vmin.f32 %v1394_v47, 6.0 }
 0x101   : > { %v1401_v34 = vmax.f32 %v1361_v59, 0.0 }
 0x102   : > { %1459 = vst.msk [vmem:[%s2960_s12 + $0x98] sm:$0xff] %vm1439_vm1, %v1426_v9  ;;  %v1305_v22 = vpop.f32.mrf.mxu0 }
 0x103   : > { %v1433_v57 = vmin.f32 %v1401_v34, 6.0  ;;  %v1306_v33 = vadd.f32 %v2936_v6, %v1305_v22 }
 0x105   : > { %1466 = vst.msk [vmem:[%s2960_s12 + $0xd0] sm:$0xff] %vm1439_vm1, %v1433_v57  ;;  %v1379_v37 = vmax.f32 %v1306_v33, 0.0 }
 0x106   : > { %v1362_v41 = vpop.f32.mrf.mxu3 }
 0x107   : > { %v1363_v28 = vadd.f32 %v2936_v6, %v1362_v41  ;;  %v1411_v48 = vmin.f32 %v1379_v37, 6.0 }
 0x109   : > { %v1402_v45 = vmax.f32 %v1363_v28, 0.0  ;;  %1444 = vst.msk [vmem:[%s2960_s12 + $0x20] sm:$0xff] %vm1439_vm1, %v1411_v48 }
 0x10a   : > { %v1307_v31 = vpop.f32.mrf.mxu0 }
 0x10b   : > { %v1434_v2 = vmin.f32 %v1402_v45, 6.0  ;;  %v1308_v56 = vadd.f32 %v2936_v6, %v1307_v31 }
 0x10d   : > { %v1325_v3 = vpop.f32.mrf.mxu1  ;;  %1467 = vst.msk [vmem:[%s2960_s12 + $0xd8] sm:$0xff] %vm1439_vm1, %v1434_v2  ;;  %v1380_v4 = vmax.f32 %v1308_v56, 0.0 }
 0x10e   : > { %v1326_v1 = vadd.f32 %v2936_v6, %v1325_v3 }
 0x10f   : > { %v1412_v30 = vmin.f32 %v1380_v4, 6.0 }
 0x110   : > { %v1387_v0 = vmax.f32 %v1326_v1, 0.0 }
 0x111   : > { %1445 = vst.msk [vmem:[%s2960_s12 + $0x28] sm:$0xff] %vm1439_vm1, %v1412_v30 }
 0x112   : > { %v1419_v58 = vmin.f32 %v1387_v0, 6.0 }
 0x114   : > { %1452 = vst.msk [vmem:[%s2960_s12 + $0x60] sm:$0xff] %vm1439_vm1, %v1419_v58 }
 0x115   : > { %v1327_v61 = vpop.f32.mrf.mxu1 }
 0x116   : > { %v1328_v5 = vadd.f32 %v2936_v6, %v1327_v61 }
 0x118   : > { %v1388_v36 = vmax.f32 %v1328_v5, 0.0 }
 0x11a   : > { %v1420_v10 = vmin.f32 %v1388_v36, 6.0 }
 0x11c   : > { %1453 = vst.msk [vmem:[%s2960_s12 + $0x68] sm:$0xff] %vm1439_vm1, %v1420_v10 }
 0x11d   : > { %v1345_v32 = vpop.f32.mrf.mxu2 }
 0x11e   : > { %v1346_v35 = vadd.f32 %v2936_v6, %v1345_v32 }
 0x120   : > { %v1395_v51 = vmax.f32 %v1346_v35, 0.0 }
 0x122   : > { %v1427_v46 = vmin.f32 %v1395_v51, 6.0 }
 0x124   : > { %1460 = vst.msk [vmem:[%s2960_s12 + $0xa0] sm:$0xff] %vm1439_vm1, %v1427_v46 }
 0x125   : > { %v1347_v50 = vpop.f32.mrf.mxu2 }
 0x126   : > { %v1348_v54 = vadd.f32 %v2936_v6, %v1347_v50 }
 0x127   : > { %v1365_v26 = vpop.f32.mrf.mxu3 }
 0x128   : > { %v1396_v49 = vmax.f32 %v1348_v54, 0.0  ;;  %v1366_v40 = vadd.f32 %v2936_v6, %v1365_v26 }
 0x12a   : > { %v1428_v23 = vmin.f32 %v1396_v49, 6.0  ;;  %v1403_v29 = vmax.f32 %v1366_v40, 0.0 }
 0x12c   : > { %1461 = vst.msk [vmem:[%s2960_s12 + $0xa8] sm:$0xff] %vm1439_vm1, %v1428_v23  ;;  %v1310_v52 = vpop.f32.mrf.mxu0  ;;  %v1435_v63 = vmin.f32 %v1403_v29, 6.0 }
 0x12d   : > { %v1311_v18 = vadd.f32 %v2936_v6, %v1310_v52 }
 0x12e   : > { %1468 = vst.msk [vmem:[%s2960_s12 + $0xe0] sm:$0xff] %vm1439_vm1, %v1435_v63 }
 0x12f   : > { %v1381_v7 = vmax.f32 %v1311_v18, 0.0  ;;  %v1367_v17 = vpop.f32.mrf.mxu3 }
 0x130   : > { %v1368_v25 = vadd.f32 %v2936_v6, %v1367_v17 }
 0x131   : > { %v1413_v16 = vmin.f32 %v1381_v7, 6.0 }
 0x132   : > { %v1404_v19 = vmax.f32 %v1368_v25, 0.0 }
 0x133   : > { %1446 = vst.msk [vmem:[%s2960_s12 + $0x30] sm:$0xff] %vm1439_vm1, %v1413_v16 }
 0x134   : > { %v1312_v43 = vpop.f32.mrf.mxu0  ;;  %v1436_v62 = vmin.f32 %v1404_v19, 6.0 }
 0x135   : > { %v1313_v55 = vadd.f32 %v2936_v6, %v1312_v43 }
 0x136   : > { %v1330_v21 = vpop.f32.mrf.mxu1  ;;  %1469 = vst.msk [vmem:[%s2960_s12 + $0xe8] sm:$0xff] %vm1439_vm1, %v1436_v62 }
 0x137   : > { %v1331_v15 = vadd.f32 %v2936_v6, %v1330_v21  ;;  %v1382_v53 = vmax.f32 %v1313_v55, 0.0 }
 0x139   : > { %v1389_v13 = vmax.f32 %v1331_v15, 0.0  ;;  %v1414_v11 = vmin.f32 %v1382_v53, 6.0 }
 0x13b   : > { %v1421_v39 = vmin.f32 %v1389_v13, 6.0  ;;  %1447 = vst.msk [vmem:[%s2960_s12 + $0x38] sm:$0xff] %vm1439_vm1, %v1414_v11 }
 0x13d   : > { %1454 = vst.msk [vmem:[%s2960_s12 + $0x70] sm:$0xff] %vm1439_vm1, %v1421_v39 }
 0x13e   : > { %v1332_v44 = vpop.f32.mrf.mxu1 }
 0x13f   : > { %v1333_v12 = vadd.f32 %v2936_v6, %v1332_v44 }
 0x141   : > { %v1390_v8 = vmax.f32 %v1333_v12, 0.0 }
 0x143   : > { %v1422_v38 = vmin.f32 %v1390_v8, 6.0 }
 0x145   : > { %1455 = vst.msk [vmem:[%s2960_s12 + $0x78] sm:$0xff] %vm1439_vm1, %v1422_v38 }
 0x146   : > { %v1350_v24 = vpop.f32.mrf.mxu2 }
 0x147   : > { %v1351_v60 = vadd.f32 %v2936_v6, %v1350_v24 }
 0x149   : > { %v1397_v27 = vmax.f32 %v1351_v60, 0.0 }
 0x14b   : > { %v1429_v14 = vmin.f32 %v1397_v27, 6.0 }
 0x14d   : > { %1462 = vst.msk [vmem:[%s2960_s12 + $0xb0] sm:$0xff] %vm1439_vm1, %v1429_v14 }
 0x14e   : > { %v1352_v42 = vpop.f32.mrf.mxu2 }
 0x14f   : > { %v1353_v20 = vadd.f32 %v2936_v6, %v1352_v42 }
 0x150   : > { %v1370_v47 = vpop.f32.mrf.mxu3 }
 0x151   : > { %v1398_v59 = vmax.f32 %v1353_v20, 0.0  ;;  %v1371_v9 = vadd.f32 %v2936_v6, %v1370_v47 }
 0x153   : > { %v1430_v34 = vmin.f32 %v1398_v59, 6.0  ;;  %v1405_v22 = vmax.f32 %v1371_v9, 0.0 }
 0x155   : > { %1463 = vst.msk [vmem:[%s2960_s12 + $0xb8] sm:$0xff] %vm1439_vm1, %v1430_v34  ;;  %v1437_v57 = vmin.f32 %v1405_v22, 6.0 }
 0x157   : > { %1470 = vst.msk [vmem:[%s2960_s12 + $0xf0] sm:$0xff] %vm1439_vm1, %v1437_v57 }
 0x158   : > { %v1372_v33 = vpop.f32.mrf.mxu3 }
 0x159   : > { %v1373_v37 = vadd.f32 %v2936_v6, %v1372_v33 }
 0x15b   : > { %v1406_v41 = vmax.f32 %v1373_v37, 0.0 }
 0x15d   : > { %v1438_v28 = vmin.f32 %v1406_v41, 6.0 }
 0x15f   : > { %1471 = vst.msk [vmem:[%s2960_s12 + $0xf8] sm:$0xff] %vm1439_vm1, %v1438_v28 }
 0x160   : > { %1860 = shalt.err (!%p1857_p3)
}
 0x161   : > { %s1897_s10 = smov 128   ;;  %s1898_s11 = smov 8  }
 0x162   : > { %1787 = dma.vmem_to_hbm [thread:$0]  (%p1967_p5), %s1486_s17, 4096, %s1488_s23, %s1473_s22, %s1897_s10, %s1897_s10, %s1898_s11  }
 0x163 PF: > { %p1793_p4 = scmp.ge.s32.totalorder %s1895_s21, 2  ;;  %s1502_s12 = sand.u32 1, %s1883_s18  }
 0x164   : > { %s1503_s13 = scalar_lea.sflag [#allocation3], %s1502_s12 }
 0x165   : > { %p1790_p7 = pnand %p1793_p4, %p1971_p6 }
 0x167   : > { %p1791_p8 = pneg %p1790_p7 }
 0x169   : > { %1878 = dma.done.wait (%p1791_p8), %s1503_s13, 4096  }
 0x16a   : > { %1880 = vsyncadd (%p1791_p8), %s1503_s13, 4294963200  ;;  %p15_p9 = scmp.ge.s32.totalorder %s1954_s24, 4   ;;  %s3287_s18 = smov %s1887_s19 }
 0x16b   : > { %s3288_s19 = smov %s1891_s20  ;;  %s3289_s20 = smov %s1965_s27 }
 0x16c   : > { %s3290_s21 = smov %s1954_s24  ;;  %17 = sbr.rel (!%p15_p9) target bundleno = 3 (0x3), region = 77 }
 0x171   :  { %1509 = vsyncpa [#allocation3], 1 }
 0x172   :  { %1511 = vsyncpa [#allocation3 + $0x1], 1 }

</bundles_post_ra>
